<compile_context>
chip_gen: v7x
topology: tpu7x:2x2x1
jax: 0.10.0
libtpu: 0.0.40
codegen_flags: <defaults>
</compile_context>

<pallas_src>
import functools

import numpy as np
import jax
import jax.numpy as jnp
from jax.experimental import pallas as pl
from jax.experimental.pallas import tpu as pltpu

LANE = 128  # TPU lane width; channel dims are padded to a multiple of this.


def _round_up(x, m):
    return ((x + m - 1) // m) * m


def _pad_axis(a, axis, new_size):
    if a.shape[axis] == new_size:
        return a
    pads = [(0, 0)] * a.ndim
    pads[axis] = (0, new_size - a.shape[axis])
    return jnp.pad(a, pads)


def bottleneck_kernel(x_ref, w1_ref, w2_ref, w3_ref,
                      s1_ref, b1_ref, s2_ref, b2_ref, s3_ref, b3_ref,
                      o_ref, pad_ref, *, H, W):
    """One image per grid step.  x_ref/o_ref: (H*W, C); pad_ref: (H+2, W+2, P)."""
    HW, _ = x_ref.shape
    P = w1_ref.shape[1]

    xf = x_ref[...]                                           # (HW, Cin) fp32

    # ---- conv1 (1x1): bf16 MXU matmul, fp32 accumulate, folded BN + ReLU ----
    h1 = jnp.dot(xf.astype(jnp.bfloat16), w1_ref[...],
                 preferred_element_type=jnp.float32)
    h1 = jnp.maximum(h1 * s1_ref[...] + b1_ref[...], 0.0)     # (HW, P) fp32

    # ---- stage h1 (bf16) into the zero-bordered VMEM scratch ----------------
    # Width halo is added at value level (2 zero columns); height halo comes
    # from the two zero rows of the scratch.  Every ref store below slices only
    # the major (row) axis, so all stores are plain unmasked vst passes.
    h1b = h1.reshape(H, W, P).astype(pad_ref.dtype)
    zcol = jnp.zeros((H, 1, P), pad_ref.dtype)
    zrow = jnp.zeros((1, W + 2, P), pad_ref.dtype)
    pad_ref[0:1, :, :] = zrow                 # rewritten each step: megacore-safe
    pad_ref[H + 1:H + 2, :, :] = zrow
    pad_ref[1:H + 1, :, :] = jnp.concatenate([zcol, h1b, zcol], axis=1)

    # ---- conv2 (3x3, stride 1, pad 1): 3 matmuls with K = 3P (width im2col) --
    acc = jnp.zeros((HW, P), jnp.float32)
    for dy in range(3):
        rows = pad_ref[dy:dy + H, :, :]                       # (H, W+2, P) bf16
        patch = jnp.concatenate(
            [rows[:, dx:dx + W, :] for dx in range(3)], axis=-1)  # (H, W, 3P)
        acc = acc + jnp.dot(patch.reshape(HW, 3 * P), w2_ref[dy],
                            preferred_element_type=jnp.float32)
    h2 = jnp.maximum(acc * s2_ref[...] + b2_ref[...], 0.0)    # (HW, P) fp32

    # ---- conv3 (1x1): bf16 matmul, folded BN, identity residual, ReLU -------
    h3 = jnp.dot(h2.astype(jnp.bfloat16), w3_ref[...],
                 preferred_element_type=jnp.float32)
    h3 = h3 * s3_ref[...] + b3_ref[...]
    o_ref[...] = jnp.maximum(h3 + xf, 0.0).astype(o_ref.dtype)


def fold_bn(gamma, beta, mean, var, eps=1e-5):
    scale = gamma / jnp.sqrt(var + eps)
    bias = beta - mean * scale
    return scale[None, :].astype(jnp.float32), bias[None, :].astype(jnp.float32)


def bottleneck_forward(x_nchw, params):
    """x_nchw: (N, Cin, H, W) float32.  Returns (N, Cout, H, W)."""
    N, Cin, H, W = x_nchw.shape
    P = params["conv1_w"].shape[0]
    Cout = params["conv3_w"].shape[0]
    # downsample=None -> identity residual requires inplanes == planes*expansion
    assert Cin == Cout, "identity residual requires inplanes == planes * expansion"
    # TODO(synk): only stride=1 conv2 is supported (module default).

    Cin_p = _round_up(Cin, LANE)
    P_p = _round_up(P, LANE)
    Cout_p = _round_up(Cout, LANE)
    HW = H * W

    # NCHW -> NHWC -> (N, H*W, Cin_p), channels zero-padded to lane width.
    x_nhwc = jnp.transpose(x_nchw, (0, 2, 3, 1))
    x2d = _pad_axis(x_nhwc, 3, Cin_p).reshape(N, HW, Cin_p)

    # Conv weights -> matmul-friendly, channel-padded, bf16 (MXU inputs).
    w1 = jnp.transpose(params["conv1_w"][:, :, 0, 0], (1, 0))      # (Cin, P)
    w1 = _pad_axis(_pad_axis(w1, 0, Cin_p), 1, P_p).astype(jnp.bfloat16)

    w2 = jnp.transpose(params["conv2_w"], (2, 3, 1, 0))            # (kh, kw, in, out)
    w2 = _pad_axis(_pad_axis(w2, 2, P_p), 3, P_p)
    w2 = w2.reshape(3, 3 * P_p, P_p).astype(jnp.bfloat16)          # per-dy K=3P layout

    w3 = jnp.transpose(params["conv3_w"][:, :, 0, 0], (1, 0))      # (P, Cout)
    w3 = _pad_axis(_pad_axis(w3, 0, P_p), 1, Cout_p).astype(jnp.bfloat16)

    s1, b1 = fold_bn(*params["bn1"])
    s2, b2 = fold_bn(*params["bn2"])
    s3, b3 = fold_bn(*params["bn3"])
    s1, b1 = _pad_axis(s1, 1, P_p), _pad_axis(b1, 1, P_p)
    s2, b2 = _pad_axis(s2, 1, P_p), _pad_axis(b2, 1, P_p)
    s3, b3 = _pad_axis(s3, 1, Cout_p), _pad_axis(b3, 1, Cout_p)

    kern = functools.partial(bottleneck_kernel, H=H, W=W)

    const2 = lambda n: (0, 0)        # weights / BN vectors: resident in VMEM
    const3 = lambda n: (0, 0, 0)

    # TODO(synk): for very large H*W tiles, additionally tile H with a +/-1-row
    # halo; per-image blocks are sufficient for standard ResNet feature maps.
    grid_spec = pltpu.PrefetchScalarGridSpec(
        num_scalar_prefetch=0,
        grid=(N,),
        in_specs=[
            pl.BlockSpec((None, HW, Cin_p), lambda n: (n, 0, 0)),   # x
            pl.BlockSpec((Cin_p, P_p), const2),                     # w1
            pl.BlockSpec((3, 3 * P_p, P_p), const3),                # w2 (K=3P)
            pl.BlockSpec((P_p, Cout_p), const2),                    # w3
            pl.BlockSpec((1, P_p), const2), pl.BlockSpec((1, P_p), const2),
            pl.BlockSpec((1, P_p), const2), pl.BlockSpec((1, P_p), const2),
            pl.BlockSpec((1, Cout_p), const2), pl.BlockSpec((1, Cout_p), const2),
        ],
        out_specs=pl.BlockSpec((None, HW, Cout_p), lambda n: (n, 0, 0)),
        scratch_shapes=[pltpu.VMEM((H + 2, W + 2, P_p), jnp.bfloat16)],
    )

    flops = 2 * N * HW * (Cin_p * P_p + 9 * P_p * P_p + P_p * Cout_p)
    bytes_accessed = ((x2d.size + N * HW * Cout_p) * 4
                      + (w1.size + w2.size + w3.size) * 2
                      + (s1.size + s2.size + s3.size) * 2 * 4)

    out2d = pl.pallas_call(
        kern,
        out_shape=jax.ShapeDtypeStruct((N, HW, Cout_p), x_nchw.dtype),
        grid_spec=grid_spec,
        compiler_params=pltpu.CompilerParams(
            dimension_semantics=("parallel",),          # shard over TCs on v7x
            vmem_limit_bytes=32 * 1024 * 1024),         # safe on v5e/v6e/v7x
        cost_estimate=pl.CostEstimate(flops=flops, transcendentals=0,
                                      bytes_accessed=bytes_accessed),
    )(x2d, w1, w2, w3, s1, b1, s2, b2, s3, b3)

    out_nhwc = out2d.reshape(N, H, W, Cout_p)[..., :Cout]
    return jnp.transpose(out_nhwc, (0, 3, 1, 2))


def ref_forward(x_nchw, params):
    """Pure-JAX (XLA conv) reference matching PyTorch eval-mode forward."""
    def conv(x, w, pad):
        return jax.lax.conv_general_dilated(
            x, w, window_strides=(1, 1), padding=pad,
            dimension_numbers=("NCHW", "OIHW", "NCHW"))

    def bn(x, p, eps=1e-5):
        g, b, m, v = p
        g, b, m, v = (t[None, :, None, None] for t in (g, b, m, v))
        return (x - m) / jnp.sqrt(v + eps) * g + b

    out = jax.nn.relu(bn(conv(x_nchw, params["conv1_w"], "VALID"), params["bn1"]))
    out = jax.nn.relu(bn(conv(out, params["conv2_w"], [(1, 1), (1, 1)]), params["bn2"]))
    out = bn(conv(out, params["conv3_w"], "VALID"), params["bn3"])
    return jax.nn.relu(out + x_nchw)


def make_params(key, inplanes, planes):
    expansion = 4
    ks = jax.random.split(key, 6)

    def bn_params(k, c):
        k1, k2, k3, k4 = jax.random.split(k, 4)
        gamma = 1.0 + 0.1 * jax.random.normal(k1, (c,), jnp.float32)
        beta = 0.1 * jax.random.normal(k2, (c,), jnp.float32)
        mean = 0.1 * jax.random.normal(k3, (c,), jnp.float32)
        var = 0.5 + jnp.abs(jax.random.normal(k4, (c,), jnp.float32)) * 0.5
        return (gamma, beta, mean, var)

    return {
        "conv1_w": 0.1 * jax.random.normal(ks[0], (planes, inplanes, 1, 1), jnp.float32),
        "conv2_w": 0.1 * jax.random.normal(ks[1], (planes, planes, 3, 3), jnp.float32),
        "conv3_w": 0.1 * jax.random.normal(ks[2], (planes * expansion, planes, 1, 1), jnp.float32),
        "bn1": bn_params(ks[3], planes),
        "bn2": bn_params(ks[4], planes),
        "bn3": bn_params(ks[5], planes * expansion),
    }


if __name__ == "__main__":
    # Bottleneck(inplanes=16, planes=4): expansion 4 -> Cout = 16 = Cin,
    # stride=1, downsample=None (identity residual is valid).
    N, Cin, H, W = 2, 16, 8, 8
    planes = 4

    key = jax.random.PRNGKey(0)
    kx, kp = jax.random.split(key)
    x = jax.random.normal(kx, (N, Cin, H, W), jnp.float32)
    params = make_params(kp, Cin, planes)

    out = jax.block_until_ready(bottleneck_forward(x, params))
    ref = jax.block_until_ready(ref_forward(x, params))

    # bf16 MXU inputs with fp32 accumulation -> loosened tolerance vs fp32 ref.
    np.testing.assert_allclose(np.asarray(out), np.asarray(ref),
                               rtol=2e-2, atol=2e-2)
    print("KERNEL_OK")
</pallas_src>

<mosaic_0001>
module attributes {stable_mosaic.version = 11 : i64} {
  func.func @bottleneck_kernel(%arg0: i32, %arg1: memref<1x64x128xf32, #tpu.memory_space<vmem>>, %arg2: memref<128x128xbf16, #tpu.memory_space<vmem>>, %arg3: memref<3x384x128xbf16, #tpu.memory_space<vmem>>, %arg4: memref<128x128xbf16, #tpu.memory_space<vmem>>, %arg5: memref<1x128xf32, #tpu.memory_space<vmem>>, %arg6: memref<1x128xf32, #tpu.memory_space<vmem>>, %arg7: memref<1x128xf32, #tpu.memory_space<vmem>>, %arg8: memref<1x128xf32, #tpu.memory_space<vmem>>, %arg9: memref<1x128xf32, #tpu.memory_space<vmem>>, %arg10: memref<1x128xf32, #tpu.memory_space<vmem>>, %arg11: memref<1x64x128xf32, #tpu.memory_space<vmem>>, %arg12: memref<10x10x128xbf16, #tpu.memory_space<vmem>>) attributes {dimension_semantics = [#tpu.dimension_semantics<parallel>], iteration_bounds = array<i64: 2>, scalar_prefetch = 0 : i64, scratch_operands = 1 : i64, tpu.core_type = #tpu.core_type<tc>, window_params = [{transform_indices = @transform_0, window_bounds = array<i64: 1, 64, 128>}, {pipeline_mode = #tpu.pipeline_mode<synchronous>, transform_indices = @transform_1, window_bounds = array<i64: 128, 128>}, {pipeline_mode = #tpu.pipeline_mode<synchronous>, transform_indices = @transform_2, window_bounds = array<i64: 3, 384, 128>}, {pipeline_mode = #tpu.pipeline_mode<synchronous>, transform_indices = @transform_3, window_bounds = array<i64: 128, 128>}, {pipeline_mode = #tpu.pipeline_mode<synchronous>, transform_indices = @transform_4, window_bounds = array<i64: 1, 128>}, {pipeline_mode = #tpu.pipeline_mode<synchronous>, transform_indices = @transform_5, window_bounds = array<i64: 1, 128>}, {pipeline_mode = #tpu.pipeline_mode<synchronous>, transform_indices = @transform_6, window_bounds = array<i64: 1, 128>}, {pipeline_mode = #tpu.pipeline_mode<synchronous>, transform_indices = @transform_7, window_bounds = array<i64: 1, 128>}, {pipeline_mode = #tpu.pipeline_mode<synchronous>, transform_indices = @transform_8, window_bounds = array<i64: 1, 128>}, {pipeline_mode = #tpu.pipeline_mode<synchronous>, transform_indices = @transform_9, window_bounds = array<i64: 1, 128>}, {transform_indices = @transform_10, window_bounds = array<i64: 1, 64, 128>}]} {
    %c0 = arith.constant 0 : index
    %c0_0 = arith.constant 0 : index
    %c0_1 = arith.constant 0 : index
    %0 = vector.load %arg1[%c0, %c0_0, %c0_1] : memref<1x64x128xf32, #tpu.memory_space<vmem>>, vector<1x64x128xf32>
    %1 = vector.shape_cast %0 : vector<1x64x128xf32> to vector<64x128xf32>
    %2 = arith.truncf %1 : vector<64x128xf32> to vector<64x128xbf16>
    %c0_2 = arith.constant 0 : index
    %c0_3 = arith.constant 0 : index
    %3 = vector.load %arg2[%c0_2, %c0_3] : memref<128x128xbf16, #tpu.memory_space<vmem>>, vector<128x128xbf16>
    %cst = arith.constant dense<0.000000e+00> : vector<64x128xf32>
    %4 = tpu.matmul %2, %3, %cst {dimension_numbers = #tpu.dot_dimension_numbers<[1], [0], [0], [1], [0, 0, 1, 1], [], []>} : vector<64x128xbf16>, vector<128x128xbf16>, vector<64x128xf32> -> vector<64x128xf32>
    %c0_4 = arith.constant 0 : index
    %c0_5 = arith.constant 0 : index
    %5 = vector.load %arg5[%c0_4, %c0_5] : memref<1x128xf32, #tpu.memory_space<vmem>>, vector<1x128xf32>
    %6 = vector.broadcast %5 : vector<1x128xf32> to vector<64x128xf32>
    %7 = arith.mulf %4, %6 : vector<64x128xf32>
    %c0_6 = arith.constant 0 : index
    %c0_7 = arith.constant 0 : index
    %8 = vector.load %arg6[%c0_6, %c0_7] : memref<1x128xf32, #tpu.memory_space<vmem>>, vector<1x128xf32>
    %9 = vector.broadcast %8 : vector<1x128xf32> to vector<64x128xf32>
    %10 = arith.addf %7, %9 : vector<64x128xf32>
    %cst_8 = arith.constant 0.000000e+00 : f32
    %11 = vector.broadcast %cst_8 : f32 to vector<64x128xf32>
    %12 = arith.maximumf %10, %11 : vector<64x128xf32>
    %13 = vector.shape_cast %12 : vector<64x128xf32> to vector<8x8x128xf32>
    %14 = arith.truncf %13 : vector<8x8x128xf32> to vector<8x8x128xbf16>
    %cst_9 = arith.constant 0.000000e+00 : bf16
    %15 = vector.broadcast %cst_9 : bf16 to vector<8x1x128xbf16>
    %cst_10 = arith.constant 0.000000e+00 : bf16
    %16 = vector.broadcast %cst_10 : bf16 to vector<1x10x128xbf16>
    %c0_11 = arith.constant 0 : index
    %c0_12 = arith.constant 0 : index
    %c0_13 = arith.constant 0 : index
    %17 = vector.load %arg12[%c0_11, %c0_12, %c0_13] : memref<10x10x128xbf16, #tpu.memory_space<vmem>>, vector<1x10x128xbf16>
    tpu.vector_store %arg12[%c0_11, %c0_12, %c0_13], %16 {strides = array<i32>} : memref<10x10x128xbf16, #tpu.memory_space<vmem>>, vector<1x10x128xbf16>,
    %c9 = arith.constant 9 : index
    %c0_14 = arith.constant 0 : index
    %c0_15 = arith.constant 0 : index
    %18 = vector.load %arg12[%c9, %c0_14, %c0_15] : memref<10x10x128xbf16, #tpu.memory_space<vmem>>, vector<1x10x128xbf16>
    tpu.vector_store %arg12[%c9, %c0_14, %c0_15], %16 {strides = array<i32>} : memref<10x10x128xbf16, #tpu.memory_space<vmem>>, vector<1x10x128xbf16>,
    %19 = tpu.concatenate %15, %14, %15 in 1 : vector<8x1x128xbf16>, vector<8x8x128xbf16>, vector<8x1x128xbf16> -> vector<8x10x128xbf16>
    %c1 = arith.constant 1 : index
    %c0_16 = arith.constant 0 : index
    %c0_17 = arith.constant 0 : index
    %20 = vector.load %arg12[%c1, %c0_16, %c0_17] : memref<10x10x128xbf16, #tpu.memory_space<vmem>>, vector<8x10x128xbf16>
    tpu.vector_store %arg12[%c1, %c0_16, %c0_17], %19 {strides = array<i32>} : memref<10x10x128xbf16, #tpu.memory_space<vmem>>, vector<8x10x128xbf16>,
    %cst_18 = arith.constant 0.000000e+00 : f32
    %21 = vector.broadcast %cst_18 : f32 to vector<64x128xf32>
    %c0_19 = arith.constant 0 : index
    %c0_20 = arith.constant 0 : index
    %c0_21 = arith.constant 0 : index
    %22 = vector.load %arg12[%c0_19, %c0_20, %c0_21] : memref<10x10x128xbf16, #tpu.memory_space<vmem>>, vector<8x10x128xbf16>
    %23 = vector.extract_strided_slice %22 {offsets = [0, 0, 0], sizes = [8, 8, 128], strides = [1, 1, 1]} : vector<8x10x128xbf16> to vector<8x8x128xbf16>
    %24 = vector.extract_strided_slice %22 {offsets = [0, 1, 0], sizes = [8, 8, 128], strides = [1, 1, 1]} : vector<8x10x128xbf16> to vector<8x8x128xbf16>
    %25 = vector.extract_strided_slice %22 {offsets = [0, 2, 0], sizes = [8, 8, 128], strides = [1, 1, 1]} : vector<8x10x128xbf16> to vector<8x8x128xbf16>
    %26 = tpu.concatenate %23, %24, %25 in 2 : vector<8x8x128xbf16>, vector<8x8x128xbf16>, vector<8x8x128xbf16> -> vector<8x8x384xbf16>
    %27 = vector.shape_cast %26 : vector<8x8x384xbf16> to vector<64x384xbf16>
    %c0_22 = arith.constant 0 : index
    %c0_23 = arith.constant 0 : index
    %c0_24 = arith.constant 0 : index
    %28 = vector.load %arg3[%c0_22, %c0_23, %c0_24] : memref<3x384x128xbf16, #tpu.memory_space<vmem>>, vector<1x384x128xbf16>
    %29 = vector.shape_cast %28 : vector<1x384x128xbf16> to vector<384x128xbf16>
    %cst_25 = arith.constant dense<0.000000e+00> : vector<64x128xf32>
    %30 = tpu.matmul %27, %29, %cst_25 {dimension_numbers = #tpu.dot_dimension_numbers<[1], [0], [0], [1], [0, 0, 1, 1], [], []>} : vector<64x384xbf16>, vector<384x128xbf16>, vector<64x128xf32> -> vector<64x128xf32>
    %31 = arith.addf %21, %30 : vector<64x128xf32>
    %c1_26 = arith.constant 1 : index
    %c0_27 = arith.constant 0 : index
    %c0_28 = arith.constant 0 : index
    %32 = vector.load %arg12[%c1_26, %c0_27, %c0_28] : memref<10x10x128xbf16, #tpu.memory_space<vmem>>, vector<8x10x128xbf16>
    %33 = vector.extract_strided_slice %32 {offsets = [0, 0, 0], sizes = [8, 8, 128], strides = [1, 1, 1]} : vector<8x10x128xbf16> to vector<8x8x128xbf16>
    %34 = vector.extract_strided_slice %32 {offsets = [0, 1, 0], sizes = [8, 8, 128], strides = [1, 1, 1]} : vector<8x10x128xbf16> to vector<8x8x128xbf16>
    %35 = vector.extract_strided_slice %32 {offsets = [0, 2, 0], sizes = [8, 8, 128], strides = [1, 1, 1]} : vector<8x10x128xbf16> to vector<8x8x128xbf16>
    %36 = tpu.concatenate %33, %34, %35 in 2 : vector<8x8x128xbf16>, vector<8x8x128xbf16>, vector<8x8x128xbf16> -> vector<8x8x384xbf16>
    %37 = vector.shape_cast %36 : vector<8x8x384xbf16> to vector<64x384xbf16>
    %c1_29 = arith.constant 1 : index
    %c0_30 = arith.constant 0 : index
    %c0_31 = arith.constant 0 : index
    %38 = vector.load %arg3[%c1_29, %c0_30, %c0_31] : memref<3x384x128xbf16, #tpu.memory_space<vmem>>, vector<1x384x128xbf16>
    %39 = vector.shape_cast %38 : vector<1x384x128xbf16> to vector<384x128xbf16>
    %cst_32 = arith.constant dense<0.000000e+00> : vector<64x128xf32>
    %40 = tpu.matmul %37, %39, %cst_32 {dimension_numbers = #tpu.dot_dimension_numbers<[1], [0], [0], [1], [0, 0, 1, 1], [], []>} : vector<64x384xbf16>, vector<384x128xbf16>, vector<64x128xf32> -> vector<64x128xf32>
    %41 = arith.addf %31, %40 : vector<64x128xf32>
    %c2 = arith.constant 2 : index
    %c0_33 = arith.constant 0 : index
    %c0_34 = arith.constant 0 : index
    %42 = vector.load %arg12[%c2, %c0_33, %c0_34] : memref<10x10x128xbf16, #tpu.memory_space<vmem>>, vector<8x10x128xbf16>
    %43 = vector.extract_strided_slice %42 {offsets = [0, 0, 0], sizes = [8, 8, 128], strides = [1, 1, 1]} : vector<8x10x128xbf16> to vector<8x8x128xbf16>
    %44 = vector.extract_strided_slice %42 {offsets = [0, 1, 0], sizes = [8, 8, 128], strides = [1, 1, 1]} : vector<8x10x128xbf16> to vector<8x8x128xbf16>
    %45 = vector.extract_strided_slice %42 {offsets = [0, 2, 0], sizes = [8, 8, 128], strides = [1, 1, 1]} : vector<8x10x128xbf16> to vector<8x8x128xbf16>
    %46 = tpu.concatenate %43, %44, %45 in 2 : vector<8x8x128xbf16>, vector<8x8x128xbf16>, vector<8x8x128xbf16> -> vector<8x8x384xbf16>
    %47 = vector.shape_cast %46 : vector<8x8x384xbf16> to vector<64x384xbf16>
    %c2_35 = arith.constant 2 : index
    %c0_36 = arith.constant 0 : index
    %c0_37 = arith.constant 0 : index
    %48 = vector.load %arg3[%c2_35, %c0_36, %c0_37] : memref<3x384x128xbf16, #tpu.memory_space<vmem>>, vector<1x384x128xbf16>
    %49 = vector.shape_cast %48 : vector<1x384x128xbf16> to vector<384x128xbf16>
    %cst_38 = arith.constant dense<0.000000e+00> : vector<64x128xf32>
    %50 = tpu.matmul %47, %49, %cst_38 {dimension_numbers = #tpu.dot_dimension_numbers<[1], [0], [0], [1], [0, 0, 1, 1], [], []>} : vector<64x384xbf16>, vector<384x128xbf16>, vector<64x128xf32> -> vector<64x128xf32>
    %51 = arith.addf %41, %50 : vector<64x128xf32>
    %c0_39 = arith.constant 0 : index
    %c0_40 = arith.constant 0 : index
    %52 = vector.load %arg7[%c0_39, %c0_40] : memref<1x128xf32, #tpu.memory_space<vmem>>, vector<1x128xf32>
    %53 = vector.broadcast %52 : vector<1x128xf32> to vector<64x128xf32>
    %54 = arith.mulf %51, %53 : vector<64x128xf32>
    %c0_41 = arith.constant 0 : index
    %c0_42 = arith.constant 0 : index
    %55 = vector.load %arg8[%c0_41, %c0_42] : memref<1x128xf32, #tpu.memory_space<vmem>>, vector<1x128xf32>
    %56 = vector.broadcast %55 : vector<1x128xf32> to vector<64x128xf32>
    %57 = arith.addf %54, %56 : vector<64x128xf32>
    %cst_43 = arith.constant 0.000000e+00 : f32
    %58 = vector.broadcast %cst_43 : f32 to vector<64x128xf32>
    %59 = arith.maximumf %57, %58 : vector<64x128xf32>
    %60 = arith.truncf %59 : vector<64x128xf32> to vector<64x128xbf16>
    %c0_44 = arith.constant 0 : index
    %c0_45 = arith.constant 0 : index
    %61 = vector.load %arg4[%c0_44, %c0_45] : memref<128x128xbf16, #tpu.memory_space<vmem>>, vector<128x128xbf16>
    %cst_46 = arith.constant dense<0.000000e+00> : vector<64x128xf32>
    %62 = tpu.matmul %60, %61, %cst_46 {dimension_numbers = #tpu.dot_dimension_numbers<[1], [0], [0], [1], [0, 0, 1, 1], [], []>} : vector<64x128xbf16>, vector<128x128xbf16>, vector<64x128xf32> -> vector<64x128xf32>
    %c0_47 = arith.constant 0 : index
    %c0_48 = arith.constant 0 : index
    %63 = vector.load %arg9[%c0_47, %c0_48] : memref<1x128xf32, #tpu.memory_space<vmem>>, vector<1x128xf32>
    %64 = vector.broadcast %63 : vector<1x128xf32> to vector<64x128xf32>
    %65 = arith.mulf %62, %64 : vector<64x128xf32>
    %c0_49 = arith.constant 0 : index
    %c0_50 = arith.constant 0 : index
    %66 = vector.load %arg10[%c0_49, %c0_50] : memref<1x128xf32, #tpu.memory_space<vmem>>, vector<1x128xf32>
    %67 = vector.broadcast %66 : vector<1x128xf32> to vector<64x128xf32>
    %68 = arith.addf %65, %67 : vector<64x128xf32>
    %69 = arith.addf %68, %1 : vector<64x128xf32>
    %cst_51 = arith.constant 0.000000e+00 : f32
    %70 = vector.broadcast %cst_51 : f32 to vector<64x128xf32>
    %71 = arith.maximumf %69, %70 : vector<64x128xf32>
    %c0_52 = arith.constant 0 : index
    %c0_53 = arith.constant 0 : index
    %c0_54 = arith.constant 0 : index
    %72 = vector.load %arg11[%c0_52, %c0_53, %c0_54] : memref<1x64x128xf32, #tpu.memory_space<vmem>>, vector<1x64x128xf32>
    %73 = vector.shape_cast %72 : vector<1x64x128xf32> to vector<64x128xf32>
    %74 = vector.shape_cast %71 : vector<64x128xf32> to vector<1x64x128xf32>
    tpu.vector_store %arg11[%c0_52, %c0_53, %c0_54], %74 {strides = array<i32>} : memref<1x64x128xf32, #tpu.memory_space<vmem>>, vector<1x64x128xf32>,
    return
  }
  func.func @transform_0(%arg0: i32) -> (i32, i32, i32) {
    %c0_i32 = arith.constant 0 : i32
    %c0_i32_0 = arith.constant 0 : i32
    %c0_i32_1 = arith.constant 0 : i32
    return %arg0, %c0_i32, %c0_i32_0 : i32, i32, i32
  }
  func.func @transform_1(%arg0: i32) -> (i32, i32) {
    %c0_i32 = arith.constant 0 : i32
    %c0_i32_0 = arith.constant 0 : i32
    %c0_i32_1 = arith.constant 0 : i32
    return %c0_i32, %c0_i32_0 : i32, i32
  }
  func.func @transform_2(%arg0: i32) -> (i32, i32, i32) {
    %c0_i32 = arith.constant 0 : i32
    %c0_i32_0 = arith.constant 0 : i32
    %c0_i32_1 = arith.constant 0 : i32
    %c0_i32_2 = arith.constant 0 : i32
    return %c0_i32, %c0_i32_0, %c0_i32_1 : i32, i32, i32
  }
  func.func @transform_3(%arg0: i32) -> (i32, i32) {
    %c0_i32 = arith.constant 0 : i32
    %c0_i32_0 = arith.constant 0 : i32
    %c0_i32_1 = arith.constant 0 : i32
    return %c0_i32, %c0_i32_0 : i32, i32
  }
  func.func @transform_4(%arg0: i32) -> (i32, i32) {
    %c0_i32 = arith.constant 0 : i32
    %c0_i32_0 = arith.constant 0 : i32
    %c0_i32_1 = arith.constant 0 : i32
    return %c0_i32, %c0_i32_0 : i32, i32
  }
  func.func @transform_5(%arg0: i32) -> (i32, i32) {
    %c0_i32 = arith.constant 0 : i32
    %c0_i32_0 = arith.constant 0 : i32
    %c0_i32_1 = arith.constant 0 : i32
    return %c0_i32, %c0_i32_0 : i32, i32
  }
  func.func @transform_6(%arg0: i32) -> (i32, i32) {
    %c0_i32 = arith.constant 0 : i32
    %c0_i32_0 = arith.constant 0 : i32
    %c0_i32_1 = arith.constant 0 : i32
    return %c0_i32, %c0_i32_0 : i32, i32
  }
  func.func @transform_7(%arg0: i32) -> (i32, i32) {
    %c0_i32 = arith.constant 0 : i32
    %c0_i32_0 = arith.constant 0 : i32
    %c0_i32_1 = arith.constant 0 : i32
    return %c0_i32, %c0_i32_0 : i32, i32
  }
  func.func @transform_8(%arg0: i32) -> (i32, i32) {
    %c0_i32 = arith.constant 0 : i32
    %c0_i32_0 = arith.constant 0 : i32
    %c0_i32_1 = arith.constant 0 : i32
    return %c0_i32, %c0_i32_0 : i32, i32
  }
  func.func @transform_9(%arg0: i32) -> (i32, i32) {
    %c0_i32 = arith.constant 0 : i32
    %c0_i32_0 = arith.constant 0 : i32
    %c0_i32_1 = arith.constant 0 : i32
    return %c0_i32, %c0_i32_0 : i32, i32
  }
  func.func @transform_10(%arg0: i32) -> (i32, i32, i32) {
    %c0_i32 = arith.constant 0 : i32
    %c0_i32_0 = arith.constant 0 : i32
    %c0_i32_1 = arith.constant 0 : i32
    return %arg0, %c0_i32, %c0_i32_0 : i32, i32, i32
  }
}

</mosaic_0001>

<bundles_post_ra>
// kernel: tpu_custom_call.1
= control target key start
LH: loop header
LB: loop body
LE: loop exit
PB: predicated region body
PF: predicated region fallthrough
CT: control target
= control target key end

     0   :  { %s4093_s0 = inlined_call_operand.hbm [shape: f32[2,64,128], index: 0, kind: input, shape index: {}]   ;;  %s4094_s1 = inlined_call_operand.hbm [shape: bf16[128,128], index: 1, kind: input, shape index: {}]   ;;  %s4095_s2 = inlined_call_operand.hbm [shape: bf16[3,384,128], index: 2, kind: input, shape index: {}]   ;;  %s4096_s3 = inlined_call_operand.hbm [shape: bf16[128,128], index: 3, kind: input, shape index: {}]   ;;  %s4097_s4 = inlined_call_operand.vmem [shape: f32[1,128], index: 4, kind: input, shape index: {}]   ;;  %s4098_s5 = inlined_call_operand.vmem [shape: f32[1,128], index: 5, kind: input, shape index: {}]   ;;  %s4099_s6 = inlined_call_operand.vmem [shape: f32[1,128], index: 6, kind: input, shape index: {}]   ;;  %s4100_s7 = inlined_call_operand.vmem [shape: f32[1,128], index: 7, kind: input, shape index: {}]   ;;  %s4101_s8 = inlined_call_operand.vmem [shape: f32[1,128], index: 8, kind: input, shape index: {}]   ;;  %s4102_s9 = inlined_call_operand.vmem [shape: f32[1,128], index: 9, kind: input, shape index: {}]   ;;  %s4103_s10 = inlined_call_operand.hbm [shape: f32[2,64,128], index: 10, kind: output, shape index: {}]  }
   0x1   :  { %4110 = sst [smem:[#allocation18_spill]] %s4102_s9 }
   0x2   :  { %4111 = sst [smem:[#allocation19_spill]] %s4103_s10 }
   0x3   :  { %15 = vsyncpa [#allocation4], 0 }
   0x4   :  { %17 = vsyncpa [#allocation4 + $0x1], 0 }
   0x5   :  { %18 = vsyncpa [#allocation7], 0 }
   0x6   :  { %19 = vsyncpa [#allocation10], 0 }
   0x7   :  { %20 = vsyncpa [#allocation5], 0 }
   0x8   :  { %22 = vsyncpa [#allocation5 + $0x1], 0  ;;  %s3577_s13 = smov 0   ;;  %s3579_s14 = smov 0  }
   0x9   :  { %s3581_s15 = smov 0   ;;  %s3583_s16 = smov 0  }
   0xa LB: > { %4112 = sst [smem:[#allocation16_spill]] %s3496_s13  ;;  %s3598_s17 = sadd.s32 4294967295, %s3508_s16   ;;  %s3508_s16 = sphi %s3583_s16, %s4142_s16   ;;  %s3504_s15 = sphi %s3581_s15, %s4141_s15   ;;  %s3500_s14 = sphi %s3579_s14, %s4140_s14   ;;  %s3496_s13 = sphi %s3577_s13, %s4139_s13  }
   0xb   : > { %s2572_s18 = sadd.s32 4294967294, %s3508_s16   ;;  %p48_p0 = scmp.ne.s32.totalorder %s3500_s14, %s3496_s13 }
   0xc   : > { %p4104_p1 = scmp.eq.s32.totalorder %s3598_s17, 0  ;;  %p267_p3 = scmp.eq.s32.totalorder %s2572_s18, 1 }
   0xd   : > { %p2573_p5 = scmp.ge.s32.totalorder %s3508_s16, 1  ;;  %p274_p7 = scmp.lt.s32.totalorder %s3508_s16, 3 }
   0xe   : > { %p3607_p4 = por %p4104_p1, %p48_p0  ;;  %p3612_p6 = por %p267_p3, %p48_p0 }
   0xf   : > { %p3617_p8 = pnand %p2573_p5, %p274_p7  ;;  %s3510_s22 = smov [#allocation6]  }
  0x10   : > { %s4113_s19 = scalar_select %p3607_p4, 1, 0 }
  0x11   : > { %s4114_s20 = scalar_select %p3612_p6, 1, 0 }
  0x12   : > { %s4116_s21 = scalar_select %p3617_p8, 1, 0 }
  0x13   : > { %4115 = sst [smem:[#allocation17_spill]] %s4114_s20  ;;  %s286_s23 = sshll.u32 %s3510_s22, 4  ;;  %s3621_s23 = int_to_ptr.vmem [resolvable:$true] %s286_s23 }
  0x14   : > { %p3120_p9 = pneg %p3617_p8  ;;  %s3511_s25 = smov [#allocation8]  }
  0x15   : > { %s299_s26 = sshll.u32 %s3511_s25, 4  ;;  %s3512_s27 = smov [#allocation9]   ;;  %s3632_s26 = int_to_ptr.vmem [resolvable:$true] %s299_s26 }
  0x16   : > { %p3628_p11 = pnand %p3120_p9, %p4104_p1  ;;  %s3634_s28 = sshll.u32 %s3512_s27, 4  ;;  %s313_s28 = int_to_ptr.vmem [resolvable:$true] %s3634_s28 }
  0x17   : > { %s3320_s11 = scalar_lea.hbm %s4094_s1, 1024 }
  0x18   : > { %p3321_p12 = scmp.ne.s32.totalorder %s4094_s1, %s3320_s11  ;;  %p3644_p13 = pneg %p3628_p11 }
  0x19   : > { %p3327_p5 = scmp.lt.u32.totalorder %s3320_s11, %s4094_s1 }
  0x1a   : > { %p3323_p0 = pnand %p3644_p13, %p3321_p12 }
  0x1c   : > { %p3324_p3 = pneg %p3323_p0 }
  0x1e   : > { %p3329_p7 = pnand %p3327_p5, %p3324_p3 }
  0x20   : > { %3332 = shalt.err (!%p3329_p7)
}
  0x21   : > { %s3333_s29 = scalar_lea.vmem %s3621_s23, 1024  ;;  %p3341_p2 = scmp.lt.s32.totalorder %s3621_s23, %s3621_s23 }
  0x22   : > { %p3334_p9 = scmp.ne.s32.totalorder %s3621_s23, %s3333_s29  ;;  %p3342_p6 = scmp.lt.s32.totalorder %s3333_s29, %s3333_s29 }
  0x24   : > { %p3336_p10 = pnand %p3334_p9, %p3644_p13  ;;  %p3343_p12 = por %p3342_p6, %p3341_p2 }
  0x26   : > { %p3337_p1 = pneg %p3336_p10 }
  0x28   : > { %p3344_p0 = pnand %p3343_p12, %p3337_p1 }
  0x2a   : > { %3347 = shalt.err (!%p3344_p0)
}
  0x2b   : > { %s3513_s30 = smov 64   ;;  %s3514_s11 = smov 4  }
  0x2c   : > { %3123 = dma.hbm_to_vmem [thread:$0]  (!%p3628_p11), %s4094_s1, 1024, %s3621_s23, [#allocation7], %s3513_s30, %s3513_s30, %s3514_s11  }
  0x2d   : > { %s3348_s29 = scalar_lea.hbm %s4095_s2, 9216 }
  0x2e   : > { %p3349_p1 = scmp.ne.s32.totalorder %s4095_s2, %s3348_s29  ;;  %p3355_p10 = scmp.lt.u32.totalorder %s3348_s29, %s4095_s2 }
  0x30   : > { %p3351_p2 = pnand %p3349_p1, %p3644_p13 }
  0x32   : > { %p3352_p6 = pneg %p3351_p2 }
  0x34   : > { %p3357_p3 = pnand %p3355_p10, %p3352_p6 }
  0x36   : > { %3360 = shalt.err (!%p3357_p3)
}
  0x37   : > { %s3361_s23 = scalar_lea.vmem %s3632_s26, 9216  ;;  %p3369_p12 = scmp.lt.s32.totalorder %s3632_s26, %s3632_s26 }
  0x38   : > { %p3362_p5 = scmp.ne.s32.totalorder %s3632_s26, %s3361_s23  ;;  %p3370_p0 = scmp.lt.s32.totalorder %s3361_s23, %s3361_s23 }
  0x3a   : > { %p3364_p7 = pnand %p3362_p5, %p3644_p13  ;;  %p3371_p1 = por %p3370_p0, %p3369_p12 }
  0x3c   : > { %p3365_p9 = pneg %p3364_p7 }
  0x3e   : > { %p3372_p2 = pnand %p3371_p1, %p3365_p9 }
  0x40   : > { %3375 = shalt.err (!%p3372_p2)
}
  0x41   : > { %3126 = dma.hbm_to_vmem [thread:$0]  (!%p3628_p11), %s4095_s2, 9216, %s3632_s26, [#allocation7], %s3513_s30, %s3513_s30, %s3514_s11  }
  0x42   : > { %s3376_s12 = scalar_lea.hbm %s4096_s3, 1024 }
  0x43   : > { %p3377_p6 = scmp.ne.s32.totalorder %s4096_s3, %s3376_s12  ;;  %p3383_p5 = scmp.lt.u32.totalorder %s3376_s12, %s4096_s3 }
  0x45   : > { %p3379_p10 = pnand %p3377_p6, %p3644_p13 }
  0x47   : > { %p3380_p3 = pneg %p3379_p10 }
  0x49   : > { %p3385_p7 = pnand %p3383_p5, %p3380_p3 }
  0x4b   : > { %3388 = shalt.err (!%p3385_p7)
}
  0x4c   : > { %s3389_s23 = scalar_lea.vmem %s313_s28, 1024  ;;  %p3397_p1 = scmp.lt.s32.totalorder %s313_s28, %s313_s28 }
  0x4d   : > { %p3390_p9 = scmp.ne.s32.totalorder %s313_s28, %s3389_s23  ;;  %p3398_p2 = scmp.lt.s32.totalorder %s3389_s23, %s3389_s23 }
  0x4f   : > { %p3392_p12 = pnand %p3390_p9, %p3644_p13  ;;  %p3399_p4 = por %p3398_p2, %p3397_p1 }
  0x51   : > { %p3393_p0 = pneg %p3392_p12 }
  0x53   : > { %p3400_p8 = pnand %p3399_p4, %p3393_p0 }
  0x55   : > { %3403 = shalt.err (!%p3400_p8)
}
  0x56   : > { %3129 = dma.hbm_to_vmem [thread:$0]  (!%p3628_p11), %s4096_s3, 1024, %s313_s28, [#allocation10], %s3513_s30, %s3513_s30, %s3514_s11  }
  0x57   : > { %s3717_s22 = sadd.s32 1, %s3508_s16   ;;  %s35_s10 = sadd.s32 1, %s3504_s15 }
  0x58   : > { %s32_s24 = ssub.s32 %s3508_s16, %s3717_s22  ;;  %p42_p8 = scmp.ne.s32.totalorder %s3504_s15, %s3500_s14 }
  0x59   : > { %p33_p4 = scmp.eq.s32.totalorder %s32_s24, 0  ;;  %p43_p13 = scmp.eq.s32.totalorder %s3508_s16, 0 }
  0x5a   : > { %p3141_p6 = scmp.lt.s32.totalorder %s3508_s16, 2  ;;  %p4119_p3 = scmp.eq.s32.totalorder %s3598_s17, 1 }
  0x5b   : > { %s3727_s13 = scalar_select %p33_p4, %s3504_s15, %s35_s10  }
  0x5c   : > { %p44_p10 = por %p43_p13, %p42_p8  ;;  %p3731_p5 = por %p4119_p3, %p42_p8 }
  0x5d   : > { %s344_s12 = sand.u32 1, %s3504_s15   ;;  %s2762_s18 = sshll.u32 %s3508_s16, 10 }
  0x5e   : > { %s2578_s28 = sshll.u32 %s344_s12, 6  ;;  %s3740_s25 = scalar_lea.hbm %s4093_s0, %s2762_s18 }
  0x5f   : > { %s348_s27 = scalar_lea.vmem [#allocation3], %s2578_s28  ;;  %p3742_p11 = pnand %p3141_p6, %p44_p10 }
  0x60   : > { %s355_s29 = sshll.u32 %s348_s27, 4  ;;  %s3748_s26 = scalar_lea.sflag [#allocation4], %s344_s12  ;;  %s3746_s29 = int_to_ptr.vmem [resolvable:$true] %s355_s29 }
  0x61   : > { %s3404_s9 = scalar_lea.hbm %s3740_s25, 1024  ;;  %p3406_p9 = pneg %p3742_p11 }
  0x62   : > { %p3405_p7 = scmp.ne.s32.totalorder %s3740_s25, %s3404_s9  ;;  %s3409_s18 = scalar_lea.hbm %s4093_s0, 2048 }
  0x63   : > { %p3410_p1 = scmp.lt.u32.totalorder %s3740_s25, %s4093_s0  ;;  %p3411_p2 = scmp.lt.u32.totalorder %s3409_s18, %s3404_s9 }
  0x64   : > { %p3407_p12 = pnand %p3406_p9, %p3405_p7  ;;  %p3413_p8 = scmp.lt.u32.totalorder %s3404_s9, %s3740_s25 }
  0x65   : > { %p3412_p4 = por %p3411_p2, %p3410_p1 }
  0x66   : > { %p3408_p0 = pneg %p3407_p12 }
  0x67   : > { %p3414_p13 = por %p3413_p8, %p3412_p4 }
  0x69   : > { %p3415_p6 = pnand %p3414_p13, %p3408_p0 }
  0x6b   : > { %3418 = shalt.err (!%p3415_p6)
}
  0x6c   : > { %s3419_s12 = scalar_lea.vmem %s3746_s29, 1024  ;;  %s3515_s11 = smov [#allocation3]  }
  0x6d   : > { %p3420_p10 = scmp.ne.s32.totalorder %s3746_s29, %s3419_s12  ;;  %s3424_s27 = sshll.u32 %s3515_s11, 4  ;;  %s3425_s27 = int_to_ptr.vmem [resolvable:$false] %s3424_s27 }
  0x6e   : > { %s3426_s24 = scalar_lea.vmem %s3425_s27, 2048  ;;  %p3427_p12 = scmp.lt.s32.totalorder %s3746_s29, %s3425_s27 }
  0x6f   : > { %p3422_p3 = pnand %p3420_p10, %p3406_p9  ;;  %p3428_p1 = scmp.lt.s32.totalorder %s3426_s24, %s3419_s12 }
  0x71   : > { %p3423_p7 = pneg %p3422_p3  ;;  %p3429_p2 = por %p3428_p1, %p3427_p12 }
  0x73   : > { %p3430_p4 = pnand %p3429_p2, %p3423_p7 }
  0x75   : > { %3433 = shalt.err (!%p3430_p4)
}
  0x76   : > { %s3516_s9 = smov 128   ;;  %s3517_s10 = smov 8  }
  0x77   : > { %3133 = dma.hbm_to_vmem [thread:$0]  (!%p3742_p11), %s3740_s25, 1024, %s3746_s29, %s3748_s26, %s3516_s9, %s3516_s9, %s3517_s10  }
  0x78   : > { %p4122_p9 = scmp.ne.s32.totalorder %s4116_s21, 0 }
  0x79   : > { %s3779_s18 = sand.u32 (!%p4122_p9), 1, %s3500_s14   ;;  %p4123_p0 = scmp.ne.s32.totalorder (!%p4122_p9), %s4113_s19, 0 }
  0x7a   : > { %367 = sbr.rel (%p4122_p9) target bundleno = 979 (0x3d3), region = 60  ;;  %s2582_s28 = sshll.u32 (!%p4122_p9), %s3779_s18, 6 }
  0x7b   : > { %s370_s30 = scalar_lea.sflag (!%p4122_p9), [#allocation4], %s3779_s18  ;;  %s3785_s12 = scalar_lea.vmem (!%p4122_p9), [#allocation3], %s2582_s28 }
  0x81   : > { %3479 = dma.done.wait (%p4123_p0), %s370_s30, 1024  }
  0x82   : > { %3481 = vsyncadd (%p4123_p0), %s370_s30, 4294966272  ;;  %p4124_p11 = scmp.eq.s32.totalorder %s3598_s17, 0 }
  0x84   : > { %3483 = dma.done.wait (%p4124_p11), [#allocation7], 10240   ;;  %p4125_p8 = pmov %p4124_p11 }
  0x86   : > { %3485 = vsyncadd (%p4125_p8), [#allocation7], 4294957056  ;;  %p4126_p13 = pmov %p4125_p8 }
  0x87   : > { %p4127_p6 = pmov %p4125_p8 }
  0x88   : > { %3487 = dma.done.wait (%p4126_p13), [#allocation10], 1024  }
  0x89   : > { %3489 = vsyncadd (%p4127_p6), [#allocation10], 4294966272  ;;  %v3188_v0 = vld [vmem:[#allocation6] sm:$0xff]   ;;  %v3189_v1 = vld [vmem:[#allocation6 + $0x8] sm:$0xff]   ;;  %v3518_v33 = vmov 0   ;;  %vm679_vm0 = vcmask 1040384  }
  0x8a   : > { %2944 = vmatprep.subr.bf16.mxu0 %v3188_v0  ;;  %v3190_v2 = vld [vmem:[#allocation6 + $0x10] sm:$0xff]   ;;  %v3191_v3 = vld [vmem:[#allocation6 + $0x18] sm:$0xff]   ;;  %v423_v4 = vld [vmem:[%s3785_s12] sm:$0xff]  ;;  %610 = vst [vmem:[#allocation2] sm:$0xf] %v3518_v33  ;;  %vm690_vm2 = vcmask 1044480  }
  0x8b   : > { %2945 = vmatpush3.bf16.msra.mxu0 %v3188_v0  ;;  %v424_v5 = vld [vmem:[%s3785_s12 + $0x8] sm:$0xff]  ;;  %v3192_v7 = vld [vmem:[#allocation6 + $0x20] sm:$0xff]   ;;  %v3194_v9 = vld [vmem:[#allocation6 + $0x30] sm:$0xff]   ;;  %611 = vst [vmem:[#allocation2 + $0x4] sm:$0x1] %v3518_v33  ;;  %s4132_s19 = sld [smem:[#allocation18_spill]] }
  0x8c   : > { %2946 = vmatprep.subr.bf16.mxu0 %v3189_v1  ;;  %v431_v6 = vpack.c.bf16 %v424_v5, %v423_v4  ;;  %v3193_v8 = vld [vmem:[#allocation6 + $0x28] sm:$0xff]   ;;  %v3195_v10 = vld [vmem:[#allocation6 + $0x38] sm:$0xff]   ;;  %v425_v11 = vld [vmem:[%s3785_s12 + $0x10] sm:$0xff]  ;;  %613 = vst [vmem:[#allocation2 + $0x48] sm:$0xf] %v3518_v33  ;;  %s4028_s21 = scalar_lea.vmem [#allocation11], %s2582_s28 }
  0x8d   : > { %v426_v12 = vld [vmem:[%s3785_s12 + $0x18] sm:$0xff]  ;;  %v427_v13 = vld [vmem:[%s3785_s12 + $0x20] sm:$0xff]  ;;  %v428_v14 = vld [vmem:[%s3785_s12 + $0x28] sm:$0xff]  ;;  %614 = vst [vmem:[#allocation2 + $0x4c] sm:$0x1] %v3518_v33  ;;  %s2763_s28 = sshll.u32 %s3598_s17, 10 }
  0x8e   : > { %2960 = vmatprep.mubr.bf16.mxu0 %v431_v6  ;;  %v432_v15 = vpack.c.bf16 %v426_v12, %v425_v11  ;;  %v433_v16 = vpack.c.bf16 %v428_v14, %v427_v13  ;;  %v429_v17 = vld [vmem:[%s3785_s12 + $0x30] sm:$0xff]  ;;  %v430_v18 = vld [vmem:[%s3785_s12 + $0x38] sm:$0xff]  ;;  %v3196_v20 = vld [vmem:[#allocation8 + $0x140] sm:$0xff]   ;;  %vm680_vm1 = vsmask.f32 256  ;;  %s2470_s25 = sshll.u32 %s4028_s21, 4  ;;  %s4046_s25 = int_to_ptr.vmem [resolvable:$true] %s2470_s25 }
  0x8f   : > { %2947 = vmatpush3.bf16.msra.mxu0 %v3189_v1  ;;  %v434_v19 = vpack.c.bf16 %v430_v18, %v429_v17  ;;  %v3198_v21 = vld [vmem:[#allocation8 + $0x148] sm:$0xff]   ;;  %v3197_v22 = vld [vmem:[#allocation8 + $0x100] sm:$0xff]   ;;  %v3201_v24 = vld [vmem:[#allocation8 + $0x150] sm:$0xff]   ;;  %vm691_vm3 = vsmask.f32 4352  ;;  %s4133_s26 = sld [smem:[#allocation19_spill]] }
  0x90   : > { %2948 = vmatprep.subr.bf16.mxu0 %v3190_v2  ;;  %2776 = vmatprep.subr.bf16.mxu1 %v3197_v22  ;;  %v3199_v23 = vld [vmem:[#allocation8 + $0xc0] sm:$0xff]   ;;  %v3200_v25 = vld [vmem:[#allocation8 + $0x108] sm:$0xff]   ;;  %v3204_v27 = vld [vmem:[#allocation8 + $0x158] sm:$0xff]   ;;  %s2457_s17 = scalar_lea.sflag [#allocation5], %s3779_s18  ;;  %s3434_s27 = scalar_lea.vmem %s4046_s25, 1024 }
  0x91   : > { %2777 = vmatpush3.bf16.msra.mxu1 %v3199_v23  ;;  %v3202_v26 = vld [vmem:[#allocation8 + $0xc8] sm:$0xff]   ;;  %v3203_v28 = vld [vmem:[#allocation8 + $0x110] sm:$0xff]   ;;  %v3207_v30 = vld [vmem:[#allocation8 + $0x160] sm:$0xff]   ;;  %p3435_p10 = scmp.ne.s32.totalorder %s4046_s25, %s3434_s27 }
  0x92   : > { %2778 = vmatprep.subr.bf16.mxu1 %v3200_v25  ;;  %v3205_v29 = vld [vmem:[#allocation8 + $0xd0] sm:$0xff]   ;;  %v3206_v31 = vld [vmem:[#allocation8 + $0x118] sm:$0xff]   ;;  %v3210_v34 = vld [vmem:[#allocation8 + $0x168] sm:$0xff]  }
  0x93   : > { %2949 = vmatpush3.bf16.msra.mxu0 %v3190_v2  ;;  %v3208_v32 = vld [vmem:[#allocation8 + $0xd8] sm:$0xff]   ;;  %v3209_v35 = vld [vmem:[#allocation8 + $0x120] sm:$0xff]   ;;  %v3213_v37 = vld [vmem:[#allocation8 + $0x170] sm:$0xff]   ;;  %p3436_p3 = pnand %p3435_p10, %p3731_p5 }
  0x94   : > { %2950 = vmatprep.subr.bf16.mxu0 %v3191_v3  ;;  %v3211_v36 = vld [vmem:[#allocation8 + $0xe0] sm:$0xff]   ;;  %v3212_v38 = vld [vmem:[#allocation8 + $0x128] sm:$0xff]   ;;  %v3215_v40 = vld [vmem:[#allocation8 + $0x130] sm:$0xff]  }
  0x95   : > { %2779 = vmatpush3.bf16.msra.mxu1 %v3202_v26  ;;  %v3214_v39 = vld [vmem:[#allocation8 + $0xe8] sm:$0xff]   ;;  %v3216_v41 = vld [vmem:[#allocation8 + $0x178] sm:$0xff]   ;;  %v3217_v42 = vld [vmem:[#allocation8 + $0xf0] sm:$0xff]   ;;  %s4044_s11 = scalar_lea.hbm %s4133_s26, %s2763_s28  ;;  %p3437_p7 = pneg %p3436_p3 }
  0x96   : > { %2780 = vmatprep.subr.bf16.mxu1 %v3203_v28  ;;  %v3218_v43 = vld [vmem:[#allocation8 + $0x138] sm:$0xff]   ;;  %v3807_v44 = vld [vmem:[#allocation8 + $0x80] sm:$0xff]   ;;  %v2595_v47 = vld [vmem:[%s4097_s4] ss:$0 sm:$0xff] }
  0x97   : > { %2951 = vmatpush3.bf16.msra.mxu0 %v3191_v3  ;;  %v3222_v45 = vld [vmem:[#allocation8 + $0xf8] sm:$0xff]   ;;  %v3225_v46 = vld [vmem:[#allocation8 + $0x40] sm:$0xff]   ;;  %v3816_v49 = vld [vmem:[%s4098_s5] ss:$0 sm:$0xff] }
  0x98   : > { %2952 = vmatprep.subr.bf16.mxu0 %v3192_v7  ;;  %vm3825_vm4 = vmand %vm679_vm0, %vm680_vm1 }
  0x99   : > { %2781 = vmatpush3.bf16.msra.mxu1 %v3205_v29  ;;  %vm3832_vm5 = vmand %vm690_vm2, %vm691_vm3 }
  0x9a   : > { %2782 = vmatprep.subr.bf16.mxu1 %v3206_v31 }
  0x9b   : > { %2953 = vmatpush3.bf16.msra.mxu0 %v3192_v7 }
  0x9c   : > { %2954 = vmatprep.subr.bf16.mxu0 %v3193_v8 }
  0x9d   : > { %2783 = vmatpush3.bf16.msra.mxu1 %v3208_v32 }
  0x9e   : > { %2784 = vmatprep.subr.bf16.mxu1 %v3209_v35 }
  0x9f   : > { %2955 = vmatpush3.bf16.msra.mxu0 %v3193_v8 }
  0xa0   : > { %2956 = vmatprep.subr.bf16.mxu0 %v3194_v9 }
  0xa1   : > { %2785 = vmatpush3.bf16.msra.mxu1 %v3211_v36 }
  0xa2   : > { %2786 = vmatprep.subr.bf16.mxu1 %v3212_v38 }
  0xa3   : > { %2957 = vmatpush3.bf16.msra.mxu0 %v3194_v9 }
  0xa4   : > { %2958 = vmatprep.subr.bf16.mxu0 %v3195_v10 }
  0xa5   : > { %2787 = vmatpush3.bf16.msra.mxu1 %v3214_v39 }
  0xa6   : > { %2788 = vmatprep.subr.bf16.mxu1 %v3215_v40 }
  0xa7   : > { %2959 = vmatpush3.bf16.msra.mxu0 %v3195_v10 }
  0xa8   : > { %2968 = vmatprep.subr.bf16.mxu0 %v3196_v20 }
  0xa9   : > { %2789 = vmatpush3.bf16.msra.mxu1 %v3217_v42 }
  0xaa   : > { %2961 = vmatmul.mubr.bf16.vlgmr.msra.gmra.mrb[0].mxu0 %v432_v15  ;;  %2790 = vmatprep.subr.bf16.mxu1 %v3218_v43 }
  0xab   : > { %2964 = vmatprep.mubr.bf16.mxu0 %v433_v16  ;;  %2969 = vmatpush3.bf16.msra.mxu0 %v3196_v20 }
  0xac   : > { %2970 = vmatprep.subr.bf16.mxu0 %v3198_v21 }
  0xad   : > { %2791 = vmatpush3.bf16.msra.mxu1 %v3222_v45 }
  0xae   : > { %2828 = vmatprep.subr.bf16.mxu1 %v3225_v46 }
  0xaf   : > { %2971 = vmatpush3.bf16.msra.mxu0 %v3198_v21 }
  0xb0   : > { %2972 = vmatprep.subr.bf16.mxu0 %v3201_v24 }
  0xb2   : > { %2965 = vmatmul.mubr.bf16.gmra.mrb[4].mxu0 %v434_v19 }
  0xb3   : > { %2973 = vmatpush3.bf16.msra.mxu0 %v3201_v24 }
  0xb4   : > { %2974 = vmatprep.subr.bf16.mxu0 %v3204_v27 }
  0xb7   : > { %2975 = vmatpush3.bf16.msra.mxu0 %v3204_v27 }
  0xb8   : > { %2976 = vmatprep.subr.bf16.mxu0 %v3207_v30 }
  0xbb   : > { %2977 = vmatpush3.bf16.msra.mxu0 %v3207_v30 }
  0xbc   : > { %2978 = vmatprep.subr.bf16.mxu0 %v3210_v34 }
  0xbf   : > { %2979 = vmatpush3.bf16.msra.mxu0 %v3210_v34 }
  0xc0   : > { %2980 = vmatprep.subr.bf16.mxu0 %v3213_v37 }
  0xc3   : > { %2981 = vmatpush3.bf16.msra.mxu0 %v3213_v37 }
  0xc4   : > { %2982 = vmatprep.subr.bf16.mxu0 %v3216_v41 }
  0xc7   : > { %2983 = vmatpush3.bf16.msra.mxu0 %v3216_v41 }
  0xc8   : > { %2992 = vmatprep.subr.bf16.mxu0 %v3807_v44 }
 0x17d   : > { %v2962_v48 = vpop.f32.mrb[0].mxu0 }
 0x17e   : > { %v573_v50 = vmul.f32 %v2962_v48, %v2595_v47  ;;  %v533_v51 = vpop.f32.mrb[1].mxu0 }
 0x17f   : > { %v571_v52 = vmul.f32 %v2595_v47, %v533_v51  ;;  %v2963_v53 = vpop.f32.mrb[2].mxu0 }
 0x180   : > { %v588_v54 = vadd.f32 %v3816_v49, %v573_v50  ;;  %v574_v55 = vmul.f32 %v2963_v53, %v2595_v47  ;;  %v536_v56 = vpop.f32.mrb[3].mxu0 }
 0x181   : > { %v586_v57 = vadd.f32 %v3816_v49, %v571_v52  ;;  %v572_v58 = vmul.f32 %v2595_v47, %v536_v56 }
 0x182   : > { %v596_v59 = vmax.f32 %v588_v54, 0.0  ;;  %v589_v60 = vadd.f32 %v3816_v49, %v574_v55 }
 0x183   : > { %v594_v61 = vmax.f32 %v586_v57, 0.0  ;;  %v587_v62 = vadd.f32 %v3816_v49, %v572_v58 }
 0x184   : > { %v604_v63 = vpack.c.bf16 %v596_v59, %v596_v59  ;;  %v597_v0 = vmax.f32 %v589_v60, 0.0 }
 0x185   : > { %v602_v1 = vpack.c.bf16 %v594_v61, %v594_v61  ;;  %v595_v2 = vmax.f32 %v587_v62, 0.0  ;;  %v2966_v3 = vpop.f32.mrb[4].mxu0 }
 0x186   : > { %v630_v4 = vshrl.u32 %v604_v63, 16  ;;  %v633_v5 = vshll.u32 %v604_v63, 16  ;;  %v605_v6 = vpack.c.bf16 %v597_v0, %v597_v0  ;;  %v577_v7 = vmul.f32 %v2966_v3, %v2595_v47  ;;  %v549_v8 = vpop.f32.mrb[5].mxu0 }
 0x187   : > { %v616_v9 = vshrl.u32 %v602_v1, 16  ;;  %v619_v10 = vshll.u32 %v602_v1, 16  ;;  %v603_v11 = vpack.c.bf16 %v595_v2, %v595_v2  ;;  %v575_v12 = vmul.f32 %v2595_v47, %v549_v8  ;;  %v2967_v13 = vpop.f32.mrb[6].mxu0 }
 0x188   : > { %v632_v14 = vrot.slane %v630_v4, 7  ;;  %v637_v15 = vshrl.u32 %v605_v6, 16  ;;  %v640_v16 = vshll.u32 %v605_v6, 16  ;;  %v592_v17 = vadd.f32 %v3816_v49, %v577_v7  ;;  %v552_v18 = vpop.f32.mrb[7].mxu0 }
 0x189   : > { %v618_v20 = vrot.slane %v616_v9, 7  ;;  %v623_v21 = vshrl.u32 %v603_v11, 16  ;;  %v626_v22 = vshll.u32 %v603_v11, 16  ;;  %v590_v23 = vadd.f32 %v3816_v49, %v575_v12 }
 0x18a   : > { %v635_v24 = vor.u32 %v633_v5, %v632_v14  ;;  %v639_v26 = vrot.slane %v637_v15, 7  ;;  %v600_v27 = vmax.f32 %v592_v17, 0.0  ;;  %v578_v28 = vmul.f32 %v2967_v13, %v2595_v47 }
 0x18b   : > { %v621_v29 = vor.u32 %v619_v10, %v618_v20  ;;  %v625_v30 = vrot.slane %v623_v21, 7  ;;  %v598_v31 = vmax.f32 %v590_v23, 0.0  ;;  %v576_v32 = vmul.f32 %v2595_v47, %v552_v18 }
 0x18c   : > { %v684_v33 = vsel %vm3825_vm4, 0, %v635_v24  ;;  %v642_v34 = vor.u32 %v640_v16, %v639_v26  ;;  %v608_v35 = vpack.c.bf16 %v600_v27, %v600_v27  ;;  %v593_v36 = vadd.f32 %v3816_v49, %v578_v28 }
 0x18d   : > { %v695_v37 = vsel %vm3832_vm5, %v684_v33, 0  ;;  %v682_v38 = vsel %vm3825_vm4, 0, %v621_v29  ;;  %v628_v39 = vor.u32 %v626_v22, %v625_v30  ;;  %v606_v40 = vpack.c.bf16 %v598_v31, %v598_v31 }
 0x18e   : > { %v2601_v41 = vcombine.low %v695_v37, %v695_v37  ;;  %v2602_v42 = vcombine.high %v695_v37, %v695_v37  ;;  %v693_v43 = vsel %vm3832_vm5, %v682_v38, 0  ;;  %v685_v45 = vsel %vm3825_vm4, 0, %v642_v34 }
 0x18f   : > { %v2597_v46 = vcombine.low %v693_v43, %v693_v43  ;;  %v2598_v47 = vcombine.high %v693_v43, %v693_v43  ;;  %v696_v48 = vsel %vm3832_vm5, %v685_v45, 0  ;;  %v683_v50 = vsel %vm3825_vm4, 0, %v628_v39 }
 0x190   : > { %762 = vst [vmem:[#allocation2 + $0x18] sm:$0xf] %v2601_v41  ;;  %763 = vst [vmem:[#allocation2 + $0x1c] sm:$0x1] %v2602_v42  ;;  %v2603_v51 = vcombine.low %v696_v48, %v696_v48  ;;  %v2604_v52 = vcombine.high %v696_v48, %v696_v48  ;;  %v694_v53 = vsel %vm3832_vm5, %v683_v50, 0  ;;  %v658_v54 = vshrl.u32 %v608_v35, 16 }
 0x191   : > { %758 = vst [vmem:[#allocation2 + $0x8] sm:$0xf] %v2597_v46  ;;  %759 = vst [vmem:[#allocation2 + $0xc] sm:$0x1] %v2598_v47  ;;  %v2599_v55 = vcombine.low %v694_v53, %v694_v53  ;;  %v2600_v56 = vcombine.high %v694_v53, %v694_v53  ;;  %v661_v57 = vshll.u32 %v608_v35, 16  ;;  %v644_v58 = vshrl.u32 %v606_v40, 16 }
 0x192   : > { %764 = vst [vmem:[#allocation2 + $0x20] sm:$0xf] %v2603_v51  ;;  %765 = vst [vmem:[#allocation2 + $0x24] sm:$0x1] %v2604_v52  ;;  %v660_v59 = vrot.slane %v658_v54, 7  ;;  %v647_v60 = vshll.u32 %v606_v40, 16  ;;  %v591_v62 = vadd.f32 %v3816_v49, %v576_v32 }
 0x193   : > { %v601_v61 = vmax.f32 %v593_v36, 0.0  ;;  %760 = vst [vmem:[#allocation2 + $0x10] sm:$0xf] %v2599_v55  ;;  %761 = vst [vmem:[#allocation2 + $0x14] sm:$0x1] %v2600_v56  ;;  %v646_v63 = vrot.slane %v644_v58, 7 }
 0x194   : > { %v663_v0 = vor.u32 %v661_v57, %v660_v59  ;;  %v599_v2 = vmax.f32 %v591_v62, 0.0  ;;  %v3226_v52 = vld [vmem:[#allocation8 + $0x88] sm:$0xff]  }
 0x195   : > { %v609_v1 = vpack.c.bf16 %v601_v61, %v601_v61  ;;  %v649_v3 = vor.u32 %v647_v60, %v646_v63 }
 0x196   : > { %v688_v4 = vsel %vm3825_vm4, 0, %v663_v0  ;;  %v607_v7 = vpack.c.bf16 %v599_v2, %v599_v2 }
 0x197   : > { %v665_v5 = vshrl.u32 %v609_v1, 16  ;;  %v668_v6 = vshll.u32 %v609_v1, 16  ;;  %v699_v8 = vsel %vm3832_vm5, %v688_v4, 0  ;;  %v686_v9 = vsel %vm3825_vm4, 0, %v649_v3  ;;  %v3860_v49 = vld [vmem:[#allocation2 + $0x18] sm:$0xf] }
 0x198   : > { %v963_v10 = vld [vmem:[#allocation2 + $0x1c] sm:$0x1]  ;;  %v2609_v11 = vcombine.low %v699_v8, %v699_v8  ;;  %v2610_v12 = vcombine.high %v699_v8, %v699_v8  ;;  %v697_v13 = vsel %vm3832_vm5, %v686_v9, 0  ;;  %v3864_v15 = vld [vmem:[#allocation2 + $0x8] sm:$0xf]  ;;  %v651_v20 = vshrl.u32 %v607_v7, 16 }
 0x199   : > { %v667_v14 = vrot.slane %v665_v5, 7  ;;  %v959_v16 = vld [vmem:[#allocation2 + $0xc] sm:$0x1]  ;;  %v2605_v17 = vcombine.low %v697_v13, %v697_v13  ;;  %v2606_v18 = vcombine.high %v697_v13, %v697_v13  ;;  %v654_v21 = vshll.u32 %v607_v7, 16  ;;  %v3866_v22 = vld [vmem:[#allocation2 + $0x20] sm:$0xf] }
 0x19a   : > { %v965_v23 = vld [vmem:[#allocation2 + $0x24] sm:$0x1]  ;;  %770 = vst [vmem:[#allocation2 + $0x38] sm:$0xf] %v2609_v11  ;;  %771 = vst [vmem:[#allocation2 + $0x3c] sm:$0x1] %v2610_v12  ;;  %v2621_v28 = vcombine.low %v3864_v15, %v959_v16  ;;  %v2623_v29 = vcombine.low %v3860_v49, %v963_v10 }
 0x19b   : > { %v670_v24 = vor.u32 %v668_v6, %v667_v14  ;;  %v3868_v26 = vld [vmem:[#allocation2 + $0x10] sm:$0xf]  ;;  %v961_v27 = vld [vmem:[#allocation2 + $0x14] sm:$0x1]  ;;  %v2624_v30 = vcombine.low %v3866_v22, %v965_v23  ;;  %766 = vst [vmem:[#allocation2 + $0x28] sm:$0xf] %v2605_v17 }
 0x19c   : > { %767 = vst [vmem:[#allocation2 + $0x2c] sm:$0x1] %v2606_v18  ;;  %v653_v31 = vrot.slane %v651_v20, 7  ;;  %v2622_v32 = vcombine.low %v3868_v26, %v961_v27  ;;  %v1070_v37 = vrot.slane %v2621_v28, 1  ;;  %v1072_v41 = vrot.slane %v2623_v29, 1  ;;  %v3232_v4 = vld [vmem:[#allocation8 + $0x90] sm:$0xff]  }
 0x19d   : > { %v689_v33 = vsel %vm3825_vm4, 0, %v670_v24  ;;  %v1073_v34 = vrot.slane %v2624_v30, 1  ;;  %v1017_v42 = vshll.u32 %v2621_v28, 16  ;;  %v1015_v46 = vshrl.u32 %v2621_v28, 16  ;;  %v3228_v6 = vld [vmem:[#allocation8] sm:$0xff]   ;;  %v3231_v12 = vld [vmem:[#allocation8 + $0x48] sm:$0xff]  }
 0x19e   : > { %v700_v35 = vsel %vm3832_vm5, %v689_v33, 0  ;;  %v656_v36 = vor.u32 %v654_v21, %v653_v31  ;;  %v1071_v38 = vrot.slane %v2622_v32, 1  ;;  %v1024_v47 = vshll.u32 %v2622_v32, 16  ;;  %v3891_v8 = vld [vmem:[#allocation2] sm:$0xf] }
 0x19f   : > { %v2611_v39 = vcombine.low %v700_v35, %v700_v35  ;;  %v2612_v40 = vcombine.high %v700_v35, %v700_v35  ;;  %v2634_v50 = vcombine.low %v1072_v41, %v1073_v34  ;;  %v1019_v51 = vrot.slane %v1017_v42, 1  ;;  %v775_v9 = vld [vmem:[#allocation2 + $0x4] sm:$0x1]  ;;  %v3895_v13 = vld [vmem:[#allocation2 + $0x8] sm:$0xf] }
 0x1a0   : > { %v687_v43 = vsel %vm3825_vm4, 0, %v656_v36  ;;  %v2631_v45 = vcombine.low %v1070_v37, %v1071_v38  ;;  %v1031_v53 = vshll.u32 %v2623_v29, 16  ;;  %v1022_v56 = vshrl.u32 %v2622_v32, 16  ;;  %v777_v14 = vld [vmem:[#allocation2 + $0xc] sm:$0x1]  ;;  %v3238_v28 = vld [vmem:[#allocation8 + $0x50] sm:$0xff]  }
 0x1a1   : > { %772 = vst [vmem:[#allocation2 + $0x40] sm:$0xf] %v2611_v39  ;;  %773 = vst [vmem:[#allocation2 + $0x44] sm:$0x1] %v2612_v40  ;;  %v698_v48 = vsel %vm3832_vm5, %v687_v43, 0  ;;  %v1026_v57 = vrot.slane %v1024_v47, 1  ;;  %v1020_v25 = vor.u32 %v1019_v51, %v1015_v46  ;;  %v3901_v23 = vcombine.low %v3891_v8, %v775_v9 }
 0x1a2   : > { %v2607_v54 = vcombine.low %v698_v48, %v698_v48  ;;  %v2608_v55 = vcombine.high %v698_v48, %v698_v48  ;;  %2984 = vmatprep.mubr.bf16.mxu0 %v2631_v45  ;;  %v3882_v58 = vld [vmem:[#allocation2 + $0x38] sm:$0xf]  ;;  %v971_v19 = vld [vmem:[#allocation2 + $0x3c] sm:$0x1]  ;;  %v1033_v59 = vrot.slane %v1031_v53, 1  ;;  %v1038_v60 = vshll.u32 %v2624_v30, 16 }
 0x1a3   : > { %2985 = vmatmul.mubr.bf16.vlgmr.msra.gmra.mrb[8].mxu0 %v2634_v50  ;;  %v3884_v61 = vld [vmem:[#allocation2 + $0x28] sm:$0xf]  ;;  %v967_v62 = vld [vmem:[#allocation2 + $0x2c] sm:$0x1]  ;;  %v1027_v63 = vor.u32 %v1026_v57, %v1022_v56  ;;  %v1029_v1 = vshrl.u32 %v2623_v29, 16  ;;  %v1036_v2 = vshrl.u32 %v2624_v30, 16  ;;  %v3889_v7 = vcombine.low %v3882_v58, %v971_v19 }
 0x1a4   : > { %768 = vst [vmem:[#allocation2 + $0x30] sm:$0xf] %v2607_v54  ;;  %769 = vst [vmem:[#allocation2 + $0x34] sm:$0x1] %v2608_v55  ;;  %2993 = vmatpush3.bf16.msra.mxu0 %v3807_v44  ;;  %v2625_v0 = vcombine.low %v3884_v61, %v967_v62  ;;  %v1040_v3 = vrot.slane %v1038_v60, 1  ;;  %v2629_v44 = vcombine.low %v3864_v15, %v3868_v26  ;;  %v3239_v15 = vld [vmem:[#allocation8 + $0x98] sm:$0xff]  }
 0x1a5   : > { %2994 = vmatprep.subr.bf16.mxu0 %v3226_v52  ;;  %v2630_v5 = vcombine.low %v1020_v25, %v1027_v63  ;;  %v1034_v10 = vor.u32 %v1033_v59, %v1029_v1  ;;  %v1076_v24 = vrot.slane %v3889_v7, 1  ;;  %v3235_v26 = vld [vmem:[#allocation8 + $0x8] sm:$0xff]   ;;  %v3905_v27 = vcombine.low %v3895_v13, %v777_v14  ;;  %v3243_v40 = vld [vmem:[#allocation8 + $0xa0] sm:$0xff]   ;;  %v3241_v43 = vld [vmem:[#allocation8 + $0x10] sm:$0xff]  }
 0x1a6   : > { %v1041_v11 = vor.u32 %v1040_v3, %v1036_v2  ;;  %v1045_v16 = vshll.u32 %v2625_v0, 16  ;;  %v1043_v29 = vshrl.u32 %v2625_v0, 16  ;;  %v1059_v30 = vshll.u32 %v3889_v7, 16  ;;  %v3242_v50 = vld [vmem:[#allocation8 + $0x58] sm:$0xff]   ;;  %v3245_v59 = vld [vmem:[#allocation8 + $0x60] sm:$0xff]   ;;  %v3250_v1 = vld [vmem:[#allocation8 + $0xb0] sm:$0xff]  }
 0x1a7   : > { %1343 = vmatprep.mubr.bf16.mxu1 %v2630_v5  ;;  %v1074_v36 = vrot.slane %v2625_v0, 1  ;;  %v886_v38 = vrot.slane %v3901_v23, 1  ;;  %v2632_v39 = vcombine.low %v3860_v49, %v3866_v22  ;;  %v887_v42 = vrot.slane %v3905_v27, 1  ;;  %v3246_v22 = vld [vmem:[#allocation8 + $0xa8] sm:$0xff]   ;;  %v3244_v19 = vld [vmem:[#allocation8 + $0x18] sm:$0xff]  }
 0x1a8   : > { %2995 = vmatpush3.bf16.msra.mxu0 %v3226_v52  ;;  %v3897_v17 = vld [vmem:[#allocation2 + $0x40] sm:$0xf]  ;;  %v973_v18 = vld [vmem:[#allocation2 + $0x44] sm:$0x1]  ;;  %1344 = vmatmul.mubr.bf16.vlgmr.msra.gmra.mrb[0].mxu1 %v2629_v44  ;;  %v2633_v20 = vcombine.low %v1034_v10, %v1041_v11  ;;  %v1047_v34 = vrot.slane %v1045_v16, 1  ;;  %v1057_v51 = vshrl.u32 %v3889_v7, 16 }
 0x1a9   : > { %2996 = vmatprep.subr.bf16.mxu0 %v3232_v4  ;;  %v2628_v21 = vcombine.low %v3897_v17, %v973_v18  ;;  %2829 = vmatpush3.bf16.msra.mxu1 %v3228_v6  ;;  %v1061_v52 = vrot.slane %v1059_v30, 1  ;;  %v2667_v56 = vcombine.low %v886_v38, %v887_v42  ;;  %v833_v60 = vshll.u32 %v3901_v23, 16  ;;  %v3918_v2 = vld [vmem:[#allocation2 + $0x10] sm:$0xf]  ;;  %v779_v3 = vld [vmem:[#allocation2 + $0x14] sm:$0x1] }
 0x1aa   : > { %1351 = vmatprep.mubr.bf16.mxu1 %v2633_v20  ;;  %2830 = vmatprep.subr.bf16.mxu1 %v3231_v12  ;;  %v1048_v48 = vor.u32 %v1047_v34, %v1043_v29  ;;  %v840_v0 = vshll.u32 %v3905_v27, 16  ;;  %v3249_v5 = vld [vmem:[#allocation8 + $0x68] sm:$0xff]   ;;  %v831_v6 = vshrl.u32 %v3901_v23, 16  ;;  %v3925_v10 = vld [vmem:[#allocation2 + $0x28] sm:$0xf]  ;;  %v2615_v18 = vcombine.low %v3918_v2, %v779_v3  ;;  %v3266_v3 = vld [vmem:[#allocation8 + $0x180] sm:$0xff]  }
 0x1ab   : > { %v3908_v31 = vld [vmem:[#allocation2 + $0x30] sm:$0xf]  ;;  %v969_v32 = vld [vmem:[#allocation2 + $0x34] sm:$0x1]  ;;  %v1077_v33 = vrot.slane %v2628_v21, 1  ;;  %v1066_v37 = vshll.u32 %v2628_v21, 16  ;;  %v1062_v25 = vor.u32 %v1061_v52, %v1057_v51 }
 0x1ac   : > { %v2626_v35 = vcombine.low %v3908_v31, %v969_v32  ;;  %2997 = vmatpush3.bf16.msra.mxu0 %v3232_v4  ;;  %v1064_v55 = vshrl.u32 %v2628_v21, 16  ;;  %v3248_v4 = vld [vmem:[#allocation8 + $0x20] sm:$0xff]   ;;  %v3921_v7 = vld [vmem:[#allocation2 + $0x18] sm:$0xf]  ;;  %v2635_v9 = vcombine.low %v3884_v61, %v3908_v31  ;;  %v781_v44 = vld [vmem:[#allocation2 + $0x1c] sm:$0x1] }
 0x1ad   : > { %2998 = vmatprep.subr.bf16.mxu0 %v3239_v15  ;;  %2831 = vmatpush3.bf16.msra.mxu1 %v3235_v26  ;;  %v2640_v47 = vcombine.low %v1076_v24, %v1077_v33  ;;  %v1068_v49 = vrot.slane %v1066_v37, 1  ;;  %v785_v11 = vld [vmem:[#allocation2 + $0x2c] sm:$0x1]  ;;  %v835_v14 = vrot.slane %v833_v60, 1  ;;  %v842_v16 = vrot.slane %v840_v0, 1  ;;  %v3255_v33 = vld [vmem:[#allocation8 + $0x30] sm:$0xff]  }
 0x1ae   : > { %v1075_v41 = vrot.slane %v2626_v35, 1  ;;  %v1050_v45 = vshrl.u32 %v2626_v35, 16  ;;  %v1052_v46 = vshll.u32 %v2626_v35, 16  ;;  %2832 = vmatprep.subr.bf16.mxu1 %v3238_v28  ;;  %v3253_v20 = vld [vmem:[#allocation8 + $0xb8] sm:$0xff]   ;;  %v3928_v21 = vld [vmem:[#allocation2 + $0x20] sm:$0xf]  ;;  %v2616_v24 = vcombine.low %v3921_v7, %v781_v44 }
 0x1af   : > { %v1069_v63 = vor.u32 %v1068_v49, %v1064_v55  ;;  %v783_v23 = vld [vmem:[#allocation2 + $0x24] sm:$0x1]  ;;  %v838_v61 = vshrl.u32 %v3905_v27, 16  ;;  %v3933_v26 = vcombine.low %v3925_v10, %v785_v11  ;;  %v836_v29 = vor.u32 %v835_v14, %v831_v6  ;;  %v3259_v35 = vld [vmem:[#allocation8 + $0x200] sm:$0xff]   ;;  %v3939_v37 = vld [vmem:[#allocation2 + $0x38] sm:$0xf] }
 0x1b0   : > { %v2637_v53 = vcombine.low %v1074_v36, %v1075_v41  ;;  %2999 = vmatpush3.bf16.msra.mxu0 %v3239_v15  ;;  %v1054_v54 = vrot.slane %v1052_v46, 1  ;;  %1352 = vmatmul.mubr.bf16.gmra.mrb[4].mxu1 %v2632_v39  ;;  %v3251_v15 = vld [vmem:[#allocation8 + $0x28] sm:$0xff]   ;;  %v3252_v28 = vld [vmem:[#allocation8 + $0x70] sm:$0xff]   ;;  %v3936_v31 = vcombine.low %v3928_v21, %v783_v23  ;;  %v847_v32 = vshll.u32 %v2615_v18, 16  ;;  %v3941_v38 = vld [vmem:[#allocation2 + $0x10] sm:$0xf] }
 0x1b1   : > { %3000 = vmatprep.subr.bf16.mxu0 %v3243_v40  ;;  %2833 = vmatpush3.bf16.msra.mxu1 %v3241_v43  ;;  %v2639_v12 = vcombine.low %v1062_v25, %v1069_v63  ;;  %v843_v30 = vor.u32 %v842_v16, %v838_v61  ;;  %v888_v34 = vrot.slane %v2615_v18, 1  ;;  %v891_v27 = vrot.slane %v3933_v26, 1  ;;  %v789_v42 = vld [vmem:[#allocation2 + $0x3c] sm:$0x1]  ;;  %v1741_v43 = vld [vmem:[#allocation2 + $0x14] sm:$0x1] }
 0x1b2   : > { %2988 = vmatprep.mubr.bf16.mxu0 %v2637_v53  ;;  %v1055_v57 = vor.u32 %v1054_v54, %v1050_v45  ;;  %2834 = vmatprep.subr.bf16.mxu1 %v3242_v50  ;;  %v854_v36 = vshll.u32 %v2616_v24, 16  ;;  %v2638_v39 = vcombine.low %v3882_v58, %v3897_v17  ;;  %v889_v41 = vrot.slane %v2616_v24, 1  ;;  %v787_v50 = vld [vmem:[#allocation2 + $0x34] sm:$0x1]  ;;  %v3264_v52 = vld [vmem:[#allocation8 + $0x208] sm:$0xff]   ;;  %v3260_v58 = vld [vmem:[#allocation8 + $0x38] sm:$0xff]  }
 0x1b3   : > { %2989 = vmatmul.mubr.bf16.gmra.mrb[12].mxu0 %v2640_v47  ;;  %v2666_v45 = vcombine.low %v836_v29, %v843_v30  ;;  %v890_v46 = vrot.slane %v3936_v31, 1  ;;  %v849_v47 = vrot.slane %v847_v32, 1  ;;  %v3948_v53 = vld [vmem:[#allocation2 + $0x18] sm:$0xf]  ;;  %v1743_v54 = vld [vmem:[#allocation2 + $0x1c] sm:$0x1] }
 0x1b4   : > { %3008 = vmatprep.mubr.bf16.mxu0 %v2667_v56  ;;  %v2636_v62 = vcombine.low %v1048_v48, %v1055_v57  ;;  %3001 = vmatpush3.bf16.msra.mxu0 %v3243_v40  ;;  %v3256_v40 = vld [vmem:[#allocation8 + $0x78] sm:$0xff]   ;;  %v3946_v48 = vld [vmem:[#allocation2 + $0x30] sm:$0xf]  ;;  %v2670_v51 = vcombine.low %v888_v34, %v889_v41  ;;  %v845_v55 = vshrl.u32 %v2615_v18, 16  ;;  %v856_v49 = vrot.slane %v854_v36, 1  ;;  %v3269_v44 = vld [vmem:[#allocation8 + $0x1c8] sm:$0xff]  }
 0x1b5   : > { %3002 = vmatprep.subr.bf16.mxu0 %v3246_v22  ;;  %2835 = vmatpush3.bf16.msra.mxu1 %v3244_v19  ;;  %v2673_v17 = vcombine.low %v890_v46, %v891_v27  ;;  %v3263_v56 = vld [vmem:[#allocation8 + $0x1c0] sm:$0xff]   ;;  %v3954_v57 = vcombine.low %v3946_v48, %v787_v50  ;;  %v3957_v19 = vcombine.low %v3939_v37, %v789_v42  ;;  %v852_v60 = vshrl.u32 %v2616_v24, 16  ;;  %v3271_v23 = vld [vmem:[#allocation8 + $0x188] sm:$0xff]   ;;  %v3277_v30 = vld [vmem:[#allocation8 + $0x190] sm:$0xff]  }
 0x1b6   : > { %1359 = vmatprep.mubr.bf16.mxu1 %v2636_v62  ;;  %2836 = vmatprep.subr.bf16.mxu1 %v3245_v59  ;;  %v850_v59 = vor.u32 %v849_v47, %v845_v55  ;;  %v3960_v62 = vcombine.low %v3948_v53, %v1743_v54  ;;  %v868_v25 = vshll.u32 %v3933_v26, 16  ;;  %v861_v6 = vshll.u32 %v3936_v31, 16  ;;  %v3279_v29 = vld [vmem:[#allocation8 + $0x220] sm:$0xff]   ;;  %v3278_v34 = vld [vmem:[#allocation8 + $0x1d8] sm:$0xff]   ;;  %v3285_v54 = vld [vmem:[#allocation8 + $0x1e8] sm:$0xff]  }
 0x1b7   : > { %v892_v63 = vrot.slane %v3954_v57, 1  ;;  %v893_v0 = vrot.slane %v3957_v19, 1  ;;  %v866_v14 = vshrl.u32 %v3933_v26, 16  ;;  %v875_v26 = vshll.u32 %v3954_v57, 16  ;;  %v3280_v41 = vld [vmem:[#allocation8 + $0x198] sm:$0xff]   ;;  %v3281_v42 = vld [vmem:[#allocation8 + $0x1e0] sm:$0xff]  }
 0x1b8   : > { %3003 = vmatpush3.bf16.msra.mxu0 %v3246_v22  ;;  %1360 = vmatmul.mubr.bf16.gmra.mrb[8].mxu1 %v2635_v9  ;;  %v3951_v22 = vcombine.low %v3941_v38, %v1741_v43  ;;  %v2665_v9 = vcombine.low %v3891_v8, %v3895_v13  ;;  %v870_v16 = vrot.slane %v868_v25, 1  ;;  %v863_v61 = vrot.slane %v861_v6, 1  ;;  %v3274_v8 = vld [vmem:[#allocation8 + $0x1d0] sm:$0xff]   ;;  %v3979_v46 = vld [vmem:[#allocation2 + $0x28] sm:$0xf]  ;;  %v3284_v50 = vld [vmem:[#allocation8 + $0x1a0] sm:$0xff]  }
 0x1b9   : > { %3004 = vmatprep.subr.bf16.mxu0 %v3250_v1  ;;  %2837 = vmatpush3.bf16.msra.mxu1 %v3248_v4  ;;  %v857_v4 = vor.u32 %v856_v49, %v852_v60  ;;  %v2676_v18 = vcombine.low %v892_v63, %v893_v0  ;;  %v859_v13 = vshrl.u32 %v3936_v31, 16  ;;  %v877_v31 = vrot.slane %v875_v26, 1  ;;  %v1747_v47 = vld [vmem:[#allocation2 + $0x2c] sm:$0x1]  ;;  %v3989_v60 = vld [vmem:[#allocation2 + $0x38] sm:$0xf] }
 0x1ba   : > { %1367 = vmatprep.mubr.bf16.mxu1 %v2639_v12  ;;  %2838 = vmatprep.subr.bf16.mxu1 %v3249_v5  ;;  %v1852_v5 = vrot.slane %v3951_v22, 1  ;;  %v1853_v12 = vrot.slane %v3960_v62, 1  ;;  %v871_v24 = vor.u32 %v870_v16, %v866_v14  ;;  %v880_v36 = vshrl.u32 %v3957_v19, 16  ;;  %v3289_v49 = vld [vmem:[#allocation8 + $0x238] sm:$0xff]   ;;  %v1751_v25 = vld [vmem:[#allocation2 + $0x3c] sm:$0x1] }
 0x1bb   : > { %v2669_v11 = vcombine.low %v850_v59, %v857_v4  ;;  %v864_v32 = vor.u32 %v863_v61, %v859_v13  ;;  %v1749_v59 = vld [vmem:[#allocation2 + $0x34] sm:$0x1]  ;;  %v2706_v6 = vcombine.low %v3989_v60, %v1751_v25  ;;  %v1753_v26 = vld [vmem:[#allocation2 + $0x44] sm:$0x1] }
 0x1bc   : > { %3005 = vmatpush3.bf16.msra.mxu0 %v3250_v1  ;;  %v3270_v1 = vld [vmem:[#allocation8 + $0x210] sm:$0xff]  }
 0x1bd   : > { %3006 = vmatprep.subr.bf16.mxu0 %v3253_v20  ;;  %2839 = vmatpush3.bf16.msra.mxu1 %v3251_v15  ;;  %v2711_v15 = vcombine.low %v1852_v5, %v1853_v12  ;;  %v2672_v27 = vcombine.low %v864_v32, %v871_v24  ;;  %v1857_v14 = vrot.slane %v2706_v6, 1  ;;  %v1752_v24 = vld [vmem:[#allocation2 + $0x40] sm:$0xf] }
 0x1be   : > { %2840 = vmatprep.subr.bf16.mxu1 %v3252_v28  ;;  %v882_v28 = vshll.u32 %v3957_v19, 16  ;;  %v3987_v19 = vld [vmem:[#allocation2 + $0x30] sm:$0xf] }
 0x1bf   : > { %v2705_v5 = vcombine.low %v3987_v19, %v1749_v59  ;;  %v2715_v59 = vcombine.low %v3987_v19, %v3989_v60  ;;  %v3309_v19 = vld [vmem:[#allocation9 + $0x28] sm:$0xff]   ;;  %v3310_v60 = vld [vmem:[#allocation9 + $0x30] sm:$0xff]  }
 0x1c0   : > { %3007 = vmatpush3.bf16.msra.mxu0 %v3253_v20  ;;  %1368 = vmatmul.mubr.bf16.gmra.mrb[12].mxu1 %v2638_v39  ;;  %v3275_v20 = vld [vmem:[#allocation8 + $0x218] sm:$0xff]   ;;  %v884_v39 = vrot.slane %v882_v28, 1 }
 0x1c1   : > { %3016 = vmatprep.subr.bf16.mxu0 %v3259_v35  ;;  %2841 = vmatpush3.bf16.msra.mxu1 %v3255_v33  ;;  %v2668_v33 = vcombine.low %v3918_v2, %v3921_v7  ;;  %v1799_v7 = vshll.u32 %v3951_v22, 16 }
 0x1c2   : > { %1641 = vmatprep.mubr.bf16.mxu1 %v2666_v45  ;;  %2842 = vmatprep.subr.bf16.mxu1 %v3256_v40  ;;  %v3282_v40 = vld [vmem:[#allocation8 + $0x228] sm:$0xff]   ;;  %v885_v2 = vor.u32 %v884_v39, %v880_v36  ;;  %v3286_v45 = vld [vmem:[#allocation8 + $0x230] sm:$0xff]  }
 0x1c3   : > { %3009 = vmatmul.mubr.bf16.vlgmr.msra.gmra.mrb[8].mxu0 %v2670_v51  ;;  %v1806_v51 = vshll.u32 %v3960_v62, 16 }
 0x1c4   : > { %3012 = vmatprep.mubr.bf16.mxu0 %v2673_v17  ;;  %3017 = vmatpush3.bf16.msra.mxu0 %v3259_v35  ;;  %v873_v35 = vshrl.u32 %v3954_v57, 16  ;;  %v1745_v17 = vld [vmem:[#allocation2 + $0x24] sm:$0x1]  ;;  %v2704_v57 = vcombine.low %v3979_v46, %v1747_v47 }
 0x1c5   : > { %3018 = vmatprep.subr.bf16.mxu0 %v3264_v52  ;;  %2843 = vmatpush3.bf16.msra.mxu1 %v3260_v58  ;;  %v3984_v58 = vld [vmem:[#allocation2 + $0x20] sm:$0xf]  ;;  %v1808_v63 = vrot.slane %v1806_v51, 1 }
 0x1c6   : > { %2880 = vmatprep.subr.bf16.mxu1 %v3263_v56  ;;  %v878_v43 = vor.u32 %v877_v31, %v873_v35  ;;  %v1801_v56 = vrot.slane %v1799_v7, 1  ;;  %v2703_v0 = vcombine.low %v3984_v58, %v1745_v17  ;;  %v1827_v35 = vshll.u32 %v2705_v5, 16 }
 0x1c8   : > { %3019 = vmatpush3.bf16.msra.mxu0 %v3264_v52  ;;  %1642 = vmatmul.mubr.bf16.vlgmr.msra.gmra.mrb[16].mxu1 %v2665_v9  ;;  %v2671_v52 = vcombine.low %v3928_v21, %v3925_v10  ;;  %v2675_v55 = vcombine.low %v878_v43, %v885_v2  ;;  %v3287_v10 = vld [vmem:[#allocation8 + $0x1a8] sm:$0xff]   ;;  %v1797_v21 = vshrl.u32 %v3951_v22, 16  ;;  %v1820_v9 = vshll.u32 %v2704_v57, 16 }
 0x1c9   : > { %3020 = vmatprep.subr.bf16.mxu0 %v3270_v1  ;;  %2881 = vmatpush3.bf16.msra.mxu1 %v3266_v3  ;;  %v1804_v3 = vshrl.u32 %v3960_v62, 16  ;;  %v1856_v22 = vrot.slane %v2705_v5, 1  ;;  %v1813_v16 = vshll.u32 %v2703_v0, 16  ;;  %v3292_v62 = vld [vmem:[#allocation8 + $0x1f8] sm:$0xff]   ;;  %v1829_v43 = vrot.slane %v1827_v35, 1 }
 0x1ca   : > { %1649 = vmatprep.mubr.bf16.mxu1 %v2669_v11  ;;  %2882 = vmatprep.subr.bf16.mxu1 %v3269_v44  ;;  %v1802_v4 = vor.u32 %v1801_v56, %v1797_v21  ;;  %v1855_v44 = vrot.slane %v2704_v57, 1  ;;  %v3291_v11 = vld [vmem:[#allocation8 + $0x1b0] sm:$0xff]   ;;  %v1822_v13 = vrot.slane %v1820_v9, 1  ;;  %v1832_v2 = vshrl.u32 %v2706_v6, 16  ;;  %v3304_v21 = vld [vmem:[#allocation9] sm:$0xff]  }
 0x1cb   : > { %3013 = vmatmul.mubr.bf16.gmra.mrb[12].mxu0 %v2676_v18  ;;  %v1809_v12 = vor.u32 %v1808_v63, %v1804_v3  ;;  %v2674_v18 = vcombine.low %v3946_v48, %v3939_v37  ;;  %v1815_v32 = vrot.slane %v1813_v16, 1  ;;  %v2707_v37 = vcombine.low %v1752_v24, %v1753_v26  ;;  %v3307_v63 = vld [vmem:[#allocation9 + $0x18] sm:$0xff]  }
 0x1cc   : > { %3021 = vmatpush3.bf16.msra.mxu0 %v3270_v1  ;;  %3032 = vmatprep.mubr.bf16.mxu0 %v2711_v15  ;;  %v3288_v1 = vld [vmem:[#allocation8 + $0x1f0] sm:$0xff]   ;;  %v1755_v15 = vld [vmem:[#allocation2 + $0x4c] sm:$0x1] }
 0x1cd   : > { %3022 = vmatprep.subr.bf16.mxu0 %v3275_v20  ;;  %2883 = vmatpush3.bf16.msra.mxu1 %v3271_v23  ;;  %v1754_v23 = vld [vmem:[#allocation2 + $0x48] sm:$0xf]  ;;  %v2710_v61 = vcombine.low %v1802_v4, %v1809_v12  ;;  %v1858_v31 = vrot.slane %v2707_v37, 1  ;;  %v1841_v51 = vshll.u32 %v2707_v37, 16 }
 0x1ce   : > { %2884 = vmatprep.subr.bf16.mxu1 %v3274_v8  ;;  %v1818_v8 = vshrl.u32 %v2704_v57, 16  ;;  %v2708_v48 = vcombine.low %v1754_v23, %v1755_v15 }
 0x1d0   : > { %3023 = vmatpush3.bf16.msra.mxu0 %v3275_v20  ;;  %1650 = vmatmul.mubr.bf16.gmra.mrb[20].mxu1 %v2668_v33  ;;  %v1854_v20 = vrot.slane %v2703_v0, 1  ;;  %v1811_v33 = vshrl.u32 %v2703_v0, 16  ;;  %v1859_v36 = vrot.slane %v2708_v48, 1  ;;  %v1846_v17 = vshrl.u32 %v2708_v48, 16  ;;  %v3308_v0 = vld [vmem:[#allocation9 + $0x20] sm:$0xff]  }
 0x1d1   : > { %3024 = vmatprep.subr.bf16.mxu0 %v3279_v29  ;;  %2885 = vmatpush3.bf16.msra.mxu1 %v3277_v30  ;;  %v2717_v30 = vcombine.low %v1856_v22, %v1857_v14 }
 0x1d2   : > { %1657 = vmatprep.mubr.bf16.mxu1 %v2672_v27  ;;  %2886 = vmatprep.subr.bf16.mxu1 %v3278_v34  ;;  %v2714_v28 = vcombine.low %v1854_v20, %v1855_v44  ;;  %v1823_v34 = vor.u32 %v1822_v13, %v1818_v8  ;;  %v1834_v27 = vshll.u32 %v2706_v6, 16  ;;  %v1816_v39 = vor.u32 %v1815_v32, %v1811_v33 }
 0x1d4   : > { %3025 = vmatpush3.bf16.msra.mxu0 %v3279_v29  ;;  %v3295_v29 = vld [vmem:[#allocation8 + $0x1b8] sm:$0xff]   ;;  %v1836_v7 = vrot.slane %v1834_v27, 1 }
 0x1d5   : > { %3026 = vmatprep.subr.bf16.mxu0 %v3282_v40  ;;  %2887 = vmatpush3.bf16.msra.mxu1 %v3280_v41  ;;  %v1825_v41 = vshrl.u32 %v2705_v5, 16 }
 0x1d6   : > { %2888 = vmatprep.subr.bf16.mxu1 %v3281_v42  ;;  %v2713_v42 = vcombine.low %v1816_v39, %v1823_v34 }
 0x1d7   : > { %v1830_v47 = vor.u32 %v1829_v43, %v1825_v41 }
 0x1d8   : > { %3027 = vmatpush3.bf16.msra.mxu0 %v3282_v40  ;;  %1658 = vmatmul.mubr.bf16.gmra.mrb[24].mxu1 %v2671_v52  ;;  %v2709_v40 = vcombine.low %v3941_v38, %v3948_v53  ;;  %v1848_v52 = vshll.u32 %v2708_v48, 16  ;;  %v1843_v38 = vrot.slane %v1841_v51, 1 }
 0x1d9   : > { %3028 = vmatprep.subr.bf16.mxu0 %v3286_v45  ;;  %2889 = vmatpush3.bf16.msra.mxu1 %v3284_v50  ;;  %v1837_v50 = vor.u32 %v1836_v7, %v1832_v2 }
 0x1da   : > { %1665 = vmatprep.mubr.bf16.mxu1 %v2675_v55  ;;  %2890 = vmatprep.subr.bf16.mxu1 %v3285_v54  ;;  %v2712_v54 = vcombine.low %v3984_v58, %v3979_v46  ;;  %v1850_v53 = vrot.slane %v1848_v52, 1  ;;  %v3305_v46 = vld [vmem:[#allocation9 + $0x8] sm:$0xff]   ;;  %v3306_v58 = vld [vmem:[#allocation9 + $0x10] sm:$0xff]  }
 0x1db   : > { %v2716_v55 = vcombine.low %v1830_v47, %v1837_v50 }
 0x1dc   : > { %3029 = vmatpush3.bf16.msra.mxu0 %v3286_v45  ;;  %v2720_v45 = vcombine.low %v1858_v31, %v1859_v36  ;;  %v1851_v57 = vor.u32 %v1850_v53, %v1846_v17 }
 0x1dd   : > { %3030 = vmatprep.subr.bf16.mxu0 %v3289_v49  ;;  %2891 = vmatpush3.bf16.msra.mxu1 %v3287_v10  ;;  %v2718_v10 = vcombine.low %v1752_v24, %v1754_v23 }
 0x1de   : > { %2892 = vmatprep.subr.bf16.mxu1 %v3288_v1  ;;  %v3311_v1 = vld [vmem:[#allocation9 + $0x38] sm:$0xff]  }
 0x1e0   : > { %3031 = vmatpush3.bf16.msra.mxu0 %v3289_v49  ;;  %1666 = vmatmul.mubr.bf16.gmra.mrb[28].mxu1 %v2674_v18  ;;  %v1839_v49 = vshrl.u32 %v2707_v37, 16 }
 0x1e1   : > { %2893 = vmatpush3.bf16.msra.mxu1 %v3291_v11  ;;  %2125 = vmatprep.mubr.bf16.mxu1 %v2710_v61 }
 0x1e2   : > { %2894 = vmatprep.subr.bf16.mxu1 %v3292_v62  ;;  %v1844_v56 = vor.u32 %v1843_v38, %v1839_v49 }
 0x1e3   : > { %3033 = vmatmul.mubr.bf16.vlgmr.msra.gmra.mrb[8].mxu0 %v2714_v28 }
 0x1e4   : > { %3036 = vmatprep.mubr.bf16.mxu0 %v2717_v30  ;;  %v2719_v25 = vcombine.low %v1844_v56, %v1851_v57 }
 0x1e5   : > { %2895 = vmatpush3.bf16.msra.mxu1 %v3295_v29 }
 0x1e6   : > { %3040 = vmatprep.subr.bf16.mxu1 %v3304_v21 }
 0x1e8   : > { %2126 = vmatmul.mubr.bf16.vlgmr.msra.gmra.mrb[32].mxu1 %v2709_v40 }
 0x1e9   : > { %2133 = vmatprep.mubr.bf16.mxu1 %v2713_v42  ;;  %3041 = vmatpush3.bf16.msra.mxu1 %v3304_v21 }
 0x1ea   : > { %3042 = vmatprep.subr.bf16.mxu1 %v3305_v46 }
 0x1eb   : > { %3037 = vmatmul.mubr.bf16.gmra.mrb[12].mxu0 %v2720_v45 }
 0x1ed   : > { %3043 = vmatpush3.bf16.msra.mxu1 %v3305_v46 }
 0x1ee   : > { %3044 = vmatprep.subr.bf16.mxu1 %v3306_v58 }
 0x1f0   : > { %2134 = vmatmul.mubr.bf16.gmra.mrb[36].mxu1 %v2712_v54 }
 0x1f1   : > { %2141 = vmatprep.mubr.bf16.mxu1 %v2716_v55  ;;  %3045 = vmatpush3.bf16.msra.mxu1 %v3306_v58 }
 0x1f2   : > { %3046 = vmatprep.subr.bf16.mxu1 %v3307_v63 }
 0x1f5   : > { %3047 = vmatpush3.bf16.msra.mxu1 %v3307_v63 }
 0x1f6   : > { %3048 = vmatprep.subr.bf16.mxu1 %v3308_v0 }
 0x1f8   : > { %2142 = vmatmul.mubr.bf16.gmra.mrb[40].mxu1 %v2715_v59 }
 0x1f9   : > { %2149 = vmatprep.mubr.bf16.mxu1 %v2719_v25  ;;  %3049 = vmatpush3.bf16.msra.mxu1 %v3308_v0 }
 0x1fa   : > { %3050 = vmatprep.subr.bf16.mxu1 %v3309_v19 }
 0x1fd   : > { %3051 = vmatpush3.bf16.msra.mxu1 %v3309_v19 }
 0x1fe   : > { %3052 = vmatprep.subr.bf16.mxu1 %v3310_v60 }
 0x200   : > { %2150 = vmatmul.mubr.bf16.gmra.mrb[44].mxu1 %v2718_v10 }
 0x201   : > { %3053 = vmatpush3.bf16.msra.mxu1 %v3310_v60 }
 0x202   : > { %3054 = vmatprep.subr.bf16.mxu1 %v3311_v1 }
 0x205   : > { %3055 = vmatpush3.bf16.msra.mxu1 %v3311_v1 }
 0x27b   : > { %v2792_v3 = vpop.f32.mrb[0].mxu1 }
 0x27c   : > { %v2793_v4 = vpop.f32.mrb[1].mxu1 }
 0x27d   : > { %v2794_v5 = vadd.f32 %v2793_v4, %v2792_v3  ;;  %v2795_v6 = vpop.f32.mrb[2].mxu1 }
 0x27e   : > { %v2796_v9 = vpop.f32.mrb[3].mxu1 }
 0x27f   : > { %v2797_v44 = vadd.f32 %v2796_v9, %v2795_v6 }
 0x283   : > { %v2798_v11 = vpop.f32.mrb[4].mxu1 }
 0x284   : > { %v2799_v12 = vpop.f32.mrb[5].mxu1 }
 0x285   : > { %v2800_v22 = vadd.f32 %v2799_v12, %v2798_v11  ;;  %v2801_v14 = vpop.f32.mrb[6].mxu1  ;;  %v2745_v11 = vld [vmem:[%s4099_s6] ss:$0 sm:$0xff] }
 0x286   : > { %v2802_v16 = vpop.f32.mrb[7].mxu1 }
 0x287   : > { %v2803_v18 = vadd.f32 %v2802_v16, %v2801_v14  ;;  %v2746_v16 = vld [vmem:[%s4100_s7] ss:$0 sm:$0xff] }
 0x28b   : > { %v2804_v62 = vpop.f32.mrb[8].mxu1 }
 0x28c   : > { %v2805_v20 = vpop.f32.mrb[9].mxu1 }
 0x28d   : > { %v2806_v23 = vadd.f32 %v2805_v20, %v2804_v62  ;;  %v2807_v15 = vpop.f32.mrb[10].mxu1 }
 0x28e   : > { %v2808_v61 = vpop.f32.mrb[11].mxu1 }
 0x28f   : > { %v2809_v8 = vadd.f32 %v2808_v61, %v2807_v15 }
 0x293   : > { %v2810_v13 = vpop.f32.mrb[12].mxu1 }
 0x294   : > { %v2811_v24 = vpop.f32.mrb[13].mxu1 }
 0x295   : > { %v2812_v26 = vadd.f32 %v2811_v24, %v2810_v13  ;;  %v2813_v28 = vpop.f32.mrb[14].mxu1 }
 0x296   : > { %v2814_v29 = vpop.f32.mrb[15].mxu1 }
 0x297   : > { %v2815_v30 = vadd.f32 %v2814_v29, %v2813_v28 }
 0x29b   : > { %v2844_v32 = vpop.f32.mrb[16].mxu1 }
 0x29c   : > { %v2845_v37 = vpop.f32.mrb[17].mxu1 }
 0x29d   : > { %v2846_v48 = vadd.f32 %v2845_v37, %v2844_v32  ;;  %v2847_v33 = vpop.f32.mrb[18].mxu1 }
 0x29e   : > { %v2848_v34 = vpop.f32.mrb[19].mxu1 }
 0x29f   : > { %v3067_v35 = vadd.f32 %v2846_v48, %v2794_v5  ;;  %v2849_v27 = vadd.f32 %v2848_v34, %v2847_v33 }
 0x2a1   : > { %v3073_v31 = vadd.f32 %v2849_v27, %v2797_v44 }
 0x2a3   : > { %v2850_v36 = vpop.f32.mrb[20].mxu1 }
 0x2a4   : > { %v2851_v39 = vpop.f32.mrb[21].mxu1 }
 0x2a5   : > { %v2852_v40 = vadd.f32 %v2851_v39, %v2850_v36  ;;  %v2853_v41 = vpop.f32.mrb[22].mxu1 }
 0x2a6   : > { %v2854_v42 = vpop.f32.mrb[23].mxu1 }
 0x2a7   : > { %v3064_v43 = vadd.f32 %v2852_v40, %v2800_v22  ;;  %v2855_v2 = vadd.f32 %v2854_v42, %v2853_v41 }
 0x2a9   : > { %v3070_v7 = vadd.f32 %v2855_v2, %v2803_v18 }
 0x2ab   : > { %v2856_v45 = vpop.f32.mrb[24].mxu1 }
 0x2ac   : > { %v2857_v47 = vpop.f32.mrb[25].mxu1 }
 0x2ad   : > { %v2858_v50 = vadd.f32 %v2857_v47, %v2856_v45  ;;  %v2859_v51 = vpop.f32.mrb[26].mxu1 }
 0x2ae   : > { %v2860_v52 = vpop.f32.mrb[27].mxu1 }
 0x2af   : > { %v3079_v54 = vadd.f32 %v2858_v50, %v2806_v23  ;;  %v2861_v17 = vadd.f32 %v2860_v52, %v2859_v51 }
 0x2b1   : > { %v3085_v55 = vadd.f32 %v2861_v17, %v2809_v8 }
 0x2b3   : > { %v2862_v49 = vpop.f32.mrb[28].mxu1 }
 0x2b4   : > { %v2863_v38 = vpop.f32.mrb[29].mxu1 }
 0x2b5   : > { %v2864_v53 = vadd.f32 %v2863_v38, %v2862_v49  ;;  %v2865_v56 = vpop.f32.mrb[30].mxu1 }
 0x2b6   : > { %v3034_v57 = vpop.f32.mrb[8].mxu0  ;;  %v2866_v59 = vpop.f32.mrb[31].mxu1 }
 0x2b7   : > { %v2192_v25 = vpop.f32.mrb[9].mxu0  ;;  %v4004_v10 = vadd.f32 %v2864_v53, %v2812_v26  ;;  %v2867_v21 = vadd.f32 %v2866_v59, %v2865_v56 }
 0x2b8   : > { %v3035_v46 = vpop.f32.mrb[10].mxu0 }
 0x2b9   : > { %v2195_v58 = vpop.f32.mrb[11].mxu0  ;;  %v4006_v63 = vadd.f32 %v2867_v21, %v2815_v30 }
 0x2bb   : > { %v2896_v0 = vpop.f32.mrb[32].mxu1 }
 0x2bc   : > { %v2897_v19 = vpop.f32.mrb[33].mxu1 }
 0x2bd   : > { %v2898_v60 = vadd.f32 %v2897_v19, %v2896_v0  ;;  %v2899_v1 = vpop.f32.mrb[34].mxu1 }
 0x2be   : > { %v3038_v3 = vpop.f32.mrb[12].mxu0  ;;  %v2900_v4 = vpop.f32.mrb[35].mxu1 }
 0x2bf   : > { %v2208_v5 = vpop.f32.mrb[13].mxu0  ;;  %v3068_v6 = vadd.f32 %v3067_v35, %v2898_v60  ;;  %v2901_v9 = vadd.f32 %v2900_v4, %v2899_v1 }
 0x2c0   : > { %v3039_v44 = vpop.f32.mrb[14].mxu0 }
 0x2c1   : > { %v2211_v12 = vpop.f32.mrb[15].mxu0  ;;  %v3069_v22 = vadd.f32 %v3068_v6, %v2192_v25  ;;  %v3074_v14 = vadd.f32 %v3073_v31, %v2901_v9 }
 0x2c3   : > { %v2238_v18 = vmul.f32 %v3069_v22, %v2745_v11  ;;  %v3075_v62 = vadd.f32 %v3074_v14, %v2195_v58  ;;  %v2902_v20 = vpop.f32.mrb[36].mxu1 }
 0x2c4   : > { %v2903_v23 = vpop.f32.mrb[37].mxu1 }
 0x2c5   : > { %v2239_v15 = vmul.f32 %v3075_v62, %v2745_v11  ;;  %v2904_v61 = vadd.f32 %v2903_v23, %v2902_v20  ;;  %v2905_v8 = vpop.f32.mrb[38].mxu1  ;;  %v2253_v13 = vadd.f32 %v2746_v16, %v2238_v18 }
 0x2c6   : > { %v2906_v24 = vpop.f32.mrb[39].mxu1 }
 0x2c7   : > { %v3065_v26 = vadd.f32 %v3064_v43, %v2904_v61  ;;  %v2907_v28 = vadd.f32 %v2906_v24, %v2905_v8  ;;  %v2254_v29 = vadd.f32 %v2746_v16, %v2239_v15  ;;  %v2261_v37 = vmax.f32 %v2253_v13, 0.0  ;;  %v3312_v13 = vld [vmem:[%s3785_s12 + $0x10] sm:$0xff] }
 0x2c9   : > { %v3066_v30 = vadd.f32 %v3065_v26, %v3034_v57  ;;  %v3071_v32 = vadd.f32 %v3070_v7, %v2907_v28  ;;  %v2262_v48 = vmax.f32 %v2254_v29, 0.0  ;;  %v3313_v28 = vld [vmem:[%s3785_s12] sm:$0xff] }
 0x2cb   : > { %v2240_v33 = vmul.f32 %v3066_v30, %v2745_v11  ;;  %v3072_v34 = vadd.f32 %v3071_v32, %v3035_v46  ;;  %v2908_v35 = vpop.f32.mrb[40].mxu1  ;;  %v2269_v27 = vpack.c.bf16 %v2262_v48, %v2261_v37  ;;  %v3314_v37 = vld [vmem:[%s3785_s12 + $0x18] sm:$0xff] }
 0x2cc   : > { %v2909_v31 = vpop.f32.mrb[41].mxu1 }
 0x2cd   : > { %v2255_v36 = vadd.f32 %v2746_v16, %v2240_v33  ;;  %v2241_v39 = vmul.f32 %v3072_v34, %v2745_v11  ;;  %v2910_v40 = vadd.f32 %v2909_v31, %v2908_v35  ;;  %v2911_v41 = vpop.f32.mrb[42].mxu1  ;;  %3056 = vmatprep.mubr.bf16.mxu1 %v2269_v27  ;;  %v3315_v34 = vld [vmem:[%s3785_s12 + $0x8] sm:$0xff] }
 0x2ce   : > { %v2912_v42 = vpop.f32.mrb[43].mxu1 }
 0x2cf   : > { %v2256_v2 = vadd.f32 %v2746_v16, %v2241_v39  ;;  %v3080_v45 = vadd.f32 %v3079_v54, %v2910_v40  ;;  %v2913_v43 = vadd.f32 %v2912_v42, %v2911_v41  ;;  %v2263_v47 = vmax.f32 %v2255_v36, 0.0 }
 0x2d1   : > { %v2264_v50 = vmax.f32 %v2256_v2, 0.0  ;;  %v3081_v51 = vadd.f32 %v3080_v45, %v2208_v5  ;;  %v3086_v7 = vadd.f32 %v3085_v55, %v2913_v43 }
 0x2d3   : > { %v2270_v52 = vpack.c.bf16 %v2264_v50, %v2263_v47  ;;  %v2242_v17 = vmul.f32 %v3081_v51, %v2745_v11  ;;  %v3087_v49 = vadd.f32 %v3086_v7, %v2211_v12  ;;  %v2914_v38 = vpop.f32.mrb[44].mxu1  ;;  %v3316_v51 = vld [vmem:[%s3785_s12 + $0x30] sm:$0xff] }
 0x2d4   : > { %v2915_v53 = vpop.f32.mrb[45].mxu1 }
 0x2d5   : > { %v2243_v56 = vmul.f32 %v3087_v49, %v2745_v11  ;;  %v2916_v57 = vadd.f32 %v2915_v53, %v2914_v38  ;;  %v2917_v59 = vpop.f32.mrb[46].mxu1  ;;  %3057 = vmatmul.mubr.bf16.vlgmr.msra.gmra.mrb[48].mxu1 %v2270_v52  ;;  %v2257_v25 = vadd.f32 %v2746_v16, %v2242_v17  ;;  %v3317_v17 = vld [vmem:[%s3785_s12 + $0x20] sm:$0xff] }
 0x2d6   : > { %v2918_v21 = vpop.f32.mrb[47].mxu1 }
 0x2d7   : > { %v3077_v46 = vadd.f32 %v4004_v10, %v2916_v57  ;;  %v2919_v58 = vadd.f32 %v2918_v21, %v2917_v59  ;;  %v2258_v54 = vadd.f32 %v2746_v16, %v2243_v56  ;;  %v2265_v60 = vmax.f32 %v2257_v25, 0.0  ;;  %v2755_v10 = vld [vmem:[%s4101_s8] ss:$0 sm:$0xff]  ;;  %v3318_v56 = vld [vmem:[%s3785_s12 + $0x38] sm:$0xff]  ;;  %v3319_v25 = vld [vmem:[%s3785_s12 + $0x28] sm:$0xff]  ;;  %s3519_s12 = smov [#allocation11]  }
 0x2d8   : > { %s3438_s24 = sshll.u32 %s3519_s12, 4  ;;  %s3439_s24 = int_to_ptr.vmem [resolvable:$false] %s3438_s24 }
 0x2d9   : > { %v3078_v0 = vadd.f32 %v3077_v46, %v3038_v3  ;;  %v3083_v19 = vadd.f32 %v4006_v63, %v2919_v58  ;;  %v2266_v55 = vmax.f32 %v2258_v54, 0.0  ;;  %v2756_v3 = vld [vmem:[%s4132_s19] ss:$0 sm:$0xff]  ;;  %s3440_s9 = scalar_lea.vmem %s3439_s24, 2048  ;;  %p3441_p12 = scmp.lt.s32.totalorder %s4046_s25, %s3439_s24 }
 0x2da   : > { %p3442_p1 = scmp.lt.s32.totalorder %s3440_s9, %s3434_s27 }
 0x2db   : > { %v2244_v1 = vmul.f32 %v3078_v0, %v2745_v11  ;;  %v3084_v4 = vadd.f32 %v3083_v19, %v3039_v44  ;;  %v2271_v5 = vpack.c.bf16 %v2266_v55, %v2265_v60 }
 0x2dc   : > { %p3443_p2 = por %p3442_p1, %p3441_p12 }
 0x2dd   : > { %v2245_v6 = vmul.f32 %v3084_v4, %v2745_v11  ;;  %3060 = vmatprep.mubr.bf16.mxu1 %v2271_v5  ;;  %v2259_v9 = vadd.f32 %v2746_v16, %v2244_v1 }
 0x2de   : > { %p3444_p4 = pnand %p3443_p2, %p3437_p7 }
 0x2df   : > { %v2260_v12 = vadd.f32 %v2746_v16, %v2245_v6  ;;  %v2267_v22 = vmax.f32 %v2259_v9, 0.0 }
 0x2e1   : > { %v2268_v14 = vmax.f32 %v2260_v12, 0.0 }
 0x2e3   : > { %v2272_v18 = vpack.c.bf16 %v2268_v14, %v2267_v22 }
 0x2e5   : > { %3061 = vmatmul.mubr.bf16.gmra.mrb[52].mxu1 %v2272_v18 }
 0x3a8   : > { %v3058_v63 = vpop.f32.mrb[48].mxu1 }
 0x3a9   : > { %v2411_v44 = vmul.f32 %v3058_v63, %v2755_v10  ;;  %v2371_v11 = vpop.f32.mrb[49].mxu1 }
 0x3aa   : > { %v2409_v62 = vmul.f32 %v2755_v10, %v2371_v11  ;;  %v3059_v16 = vpop.f32.mrb[50].mxu1 }
 0x3ab   : > { %v2426_v20 = vadd.f32 %v2756_v3, %v2411_v44  ;;  %v2412_v23 = vmul.f32 %v3059_v16, %v2755_v10  ;;  %v2374_v15 = vpop.f32.mrb[51].mxu1 }
 0x3ac   : > { %v2424_v61 = vadd.f32 %v2756_v3, %v2409_v62  ;;  %v2410_v8 = vmul.f32 %v2755_v10, %v2374_v15 }
 0x3ad   : > { %v2434_v24 = vadd.f32 %v3312_v13, %v2426_v20  ;;  %v2427_v26 = vadd.f32 %v2756_v3, %v2412_v23 }
 0x3ae   : > { %v2432_v29 = vadd.f32 %v3313_v28, %v2424_v61  ;;  %v2425_v30 = vadd.f32 %v2756_v3, %v2410_v8 }
 0x3af   : > { %v2442_v32 = vmax.f32 %v2434_v24, 0.0  ;;  %v2435_v48 = vadd.f32 %v3314_v37, %v2427_v26 }
 0x3b0   : > { %v2440_v33 = vmax.f32 %v2432_v29, 0.0  ;;  %v2433_v35 = vadd.f32 %v3315_v34, %v2425_v30 }
 0x3b1   : > { %2450 = vst [vmem:[%s4028_s21 + $0x10] sm:$0xff] %v2442_v32  ;;  %v2443_v27 = vmax.f32 %v2435_v48, 0.0 }
 0x3b2   : > { %2448 = vst [vmem:[%s4028_s21] sm:$0xff] %v2440_v33  ;;  %v2441_v31 = vmax.f32 %v2433_v35, 0.0 }
 0x3b3   : > { %2451 = vst [vmem:[%s4028_s21 + $0x18] sm:$0xff] %v2443_v27 }
 0x3b4   : > { %2449 = vst [vmem:[%s4028_s21 + $0x8] sm:$0xff] %v2441_v31 }
 0x3b8   : > { %v3062_v36 = vpop.f32.mrb[52].mxu1 }
 0x3b9   : > { %v2415_v39 = vmul.f32 %v3062_v36, %v2755_v10  ;;  %v2387_v40 = vpop.f32.mrb[53].mxu1 }
 0x3ba   : > { %v2413_v41 = vmul.f32 %v2755_v10, %v2387_v40  ;;  %v3063_v42 = vpop.f32.mrb[54].mxu1 }
 0x3bb   : > { %v2430_v2 = vadd.f32 %v2756_v3, %v2415_v39  ;;  %v2416_v45 = vmul.f32 %v3063_v42, %v2755_v10  ;;  %v2390_v43 = vpop.f32.mrb[55].mxu1 }
 0x3bc   : > { %v2428_v47 = vadd.f32 %v2756_v3, %v2413_v41  ;;  %v2414_v50 = vmul.f32 %v2755_v10, %v2390_v43 }
 0x3bd   : > { %v2438_v7 = vadd.f32 %v3316_v51, %v2430_v2  ;;  %v2431_v52 = vadd.f32 %v2756_v3, %v2416_v45 }
 0x3be   : > { %v2436_v49 = vadd.f32 %v3317_v17, %v2428_v47  ;;  %v2429_v38 = vadd.f32 %v2756_v3, %v2414_v50 }
 0x3bf   : > { %v2446_v53 = vmax.f32 %v2438_v7, 0.0  ;;  %v2439_v57 = vadd.f32 %v3318_v56, %v2431_v52 }
 0x3c0   : > { %v2444_v59 = vmax.f32 %v2436_v49, 0.0  ;;  %v2437_v21 = vadd.f32 %v3319_v25, %v2429_v38 }
 0x3c1   : > { %2454 = vst [vmem:[%s4028_s21 + $0x30] sm:$0xff] %v2446_v53  ;;  %v2447_v46 = vmax.f32 %v2439_v57, 0.0 }
 0x3c2   : > { %2452 = vst [vmem:[%s4028_s21 + $0x20] sm:$0xff] %v2444_v59  ;;  %v2445_v58 = vmax.f32 %v2437_v21, 0.0 }
 0x3c3   : > { %2455 = vst [vmem:[%s4028_s21 + $0x38] sm:$0xff] %v2447_v46 }
 0x3c4   : > { %2453 = vst [vmem:[%s4028_s21 + $0x28] sm:$0xff] %v2445_v58 }
 0x3c5   : > { %3447 = shalt.err (!%p3444_p4)
}
 0x3c6   : > { %s3448_s10 = scalar_lea.hbm %s4044_s11, 1024  ;;  %s3452_s21 = scalar_lea.hbm %s4133_s26, 2048 }
 0x3c7   : > { %p3449_p9 = scmp.ne.s32.totalorder %s4044_s11, %s3448_s10  ;;  %p3453_p8 = scmp.lt.u32.totalorder %s4044_s11, %s4133_s26 }
 0x3c8   : > { %p3454_p13 = scmp.lt.u32.totalorder %s3452_s21, %s3448_s10  ;;  %p3456_p10 = scmp.lt.u32.totalorder %s3448_s10, %s4044_s11 }
 0x3c9   : > { %p3450_p0 = pnand %p3449_p9, %p3731_p5 }
 0x3ca   : > { %p3455_p6 = por %p3454_p13, %p3453_p8 }
 0x3cb   : > { %p3451_p11 = pneg %p3450_p0 }
 0x3cc   : > { %p3457_p3 = por %p3456_p10, %p3455_p6 }
 0x3ce   : > { %p3458_p7 = pnand %p3457_p3, %p3451_p11 }
 0x3d0   : > { %3461 = shalt.err (!%p3458_p7)
}
 0x3d1   : > { %s3520_s23 = smov 128   ;;  %s3521_s27 = smov 8  }
 0x3d2   : > { %3118 = dma.vmem_to_hbm [thread:$0]  (%p3731_p5), %s4046_s25, 1024, %s4044_s11, %s2457_s17, %s3520_s23, %s3520_s23, %s3521_s27  }
 0x3d3 PF: > { %s4134_s12 = sld [smem:[#allocation16_spill]]  ;;  %s4135_s24 = sld [smem:[#allocation17_spill]] }
 0x3d4   : > { %p4137_p1 = scmp.ge.s32.totalorder %s3508_s16, 2 }
 0x3d9   : > { %s2485_s9 = sand.u32 1, %s4134_s12   ;;  %p4136_p12 = scmp.ne.s32.totalorder %s4135_s24, 0 }
 0x3da   : > { %s2486_s10 = scalar_lea.sflag [#allocation5], %s2485_s9 }
 0x3db   : > { %p3135_p2 = pnand %p4137_p1, %p4136_p12 }
 0x3dd   : > { %3491 = dma.done.wait (!%p3135_p2), %s2486_s10, 1024  }
 0x3de   : > { %3493 = vsyncadd (!%p3135_p2), %s2486_s10, 4294966272  ;;  %s4138_s30 = smov %s3727_s13  ;;  %p25_p4 = scmp.ge.s32.totalorder %s3717_s22, 4  }
 0x3df   : > { %s4139_s13 = smov %s3500_s14  ;;  %s4140_s14 = smov %s3504_s15 }
 0x3e0   : > { %s4141_s15 = smov %s4138_s30  ;;  %s4142_s16 = smov %s3717_s22 }
 0x3e1   :  { %27 = sbr.rel (!%p25_p4) target bundleno = 10 (0xa), region = 122 }
 0x3e8   :  { %2491 = vsyncpa [#allocation4], 1 }
 0x3e9   :  { %2493 = vsyncpa [#allocation4 + $0x1], 1 }
 0x3ea   :  { %2494 = vsyncpa [#allocation7], 1 }
 0x3eb   :  { %2495 = vsyncpa [#allocation10], 1 }
 0x3ec   :  { %2496 = vsyncpa [#allocation5], 1 }
 0x3ed   :  { %2498 = vsyncpa [#allocation5 + $0x1], 1 }

</bundles_post_ra>
